<compile_context>
chip_gen: v7x
topology: tpu7x:2x2x1
jax: 0.10.0
libtpu: 0.0.40
codegen_flags: <defaults>
</compile_context>

<pallas_src>
import jax
import jax.numpy as jnp
import numpy as np
from jax.experimental import pallas as pl
from jax.experimental.pallas import tpu as pltpu

# ---------------- module hyper-parameters (small synthetic config) -----------
DS_FACTOR = 16                     # total down-sampling factor
OVERSAMPLE = 2
N_FFT = OVERSAMPLE * DS_FACTOR
PAD_TOT = N_FFT - DS_FACTOR
PAD_LEFT, PAD_RIGHT = PAD_TOT // 2, PAD_TOT - PAD_TOT // 2
C_IN = 32                          # stand-in for wavlm.config.conv_dim[-1] (=512)
C_OUT = 8                          # output_channels
HIGHEST = jax.lax.Precision.HIGHEST
LANE = 128


def _round_up(x, m):
    return (x + m - 1) // m * m


# ------------------------------- Pallas kernel --------------------------------
# TODO(synk): ConvBlock's source is not part of the given module; it is
# reconstructed from open_universe as three residual [PReLU -> Conv1d(k=3)]
# stages with dilations (1, 2, 4), returning the last output (`out, *_`).
def _make_kernel(c_in, c_out, L, Lp):
    """Build the per-batch-element kernel with static shapes closed over."""

    def kernel(alphas_ref,          # SMEM (3,)            PReLU slopes
               feats_ref,           # VMEM (1, c_in, Lp)    normalized below
               w_ref,               # VMEM (4, c_out, Wlanes) packed fused weights
               b_ref,               # VMEM (c_out, 4)       packed biases
               out_ref):            # VMEM (1, c_out, Lp)
        x = feats_ref[0]                                   # (c_in, Lp)
        lane = jax.lax.broadcasted_iota(jnp.int32, (1, Lp), 1)

        # ---- feature norm: x *= rsqrt(max(mean_L(sum_C x^2), 1e-10))
        # (lanes >= L are zero-padded by the wrapper, so the sum is exact;
        #  max(sqrt(v),1e-5) == sqrt(max(v,1e-10)) for v >= 0.)
        sumsq = jnp.sum(x * x)
        inv = jax.lax.rsqrt(jnp.maximum(sumsq * (1.0 / L), 1e-10))
        x = x * inv

        def shift(a, s):
            # z[:, l] = a[:, l + s] if 0 <= l + s < L else 0  ('same' padding).
            if s == 0:
                return a
            rolled = pltpu.roll(a, shift=(-s) % Lp, axis=1)     # XLU rotation
            ok = jnp.logical_and(lane + s >= 0, lane + s < L)
            return jnp.where(ok, rolled, 0.0)

        def conv3(a, w, bcol, d):
            # 'same' K=3 dilated conv, all three taps fused into one matmul.
            xs = jnp.concatenate([shift(a, -d), a, shift(a, d)], axis=0)
            y = jnp.dot(w, xs, precision=HIGHEST,
                        preferred_element_type=jnp.float32)
            return y + bcol                                     # bias once/conv

        def prelu(a, alpha):
            return jnp.where(a >= 0, a, alpha * a)

        wp = w_ref[0, :, : 3 * c_in]      # (c_out, 3*c_in)
        w1 = w_ref[1, :, : 3 * c_out]     # (c_out, 3*c_out)
        w2 = w_ref[2, :, : 3 * c_out]
        w3 = w_ref[3, :, : 3 * c_out]

        # projection conv + ConvBlock (residual PReLU -> dilated conv stages)
        h = conv3(x, wp, b_ref[:, 0:1], 1)
        h = h + conv3(prelu(h, alphas_ref[0]), w1, b_ref[:, 1:2], 1)
        h = h + conv3(prelu(h, alphas_ref[1]), w2, b_ref[:, 2:3], 2)
        h = h + conv3(prelu(h, alphas_ref[2]), w3, b_ref[:, 3:4], 4)
        out_ref[0] = h.astype(out_ref.dtype)

    return kernel


def adapter_pallas(feats, kp):
    B, c_in, L = feats.shape
    Lp = _round_up(L, LANE)                      # lane-dense time axis
    if Lp != L:
        feats = jnp.pad(feats, ((0, 0), (0, 0), (0, Lp - L)))

    kernel = _make_kernel(c_in, C_OUT, L, Lp)
    fn = pl.pallas_call(
        kernel,
        out_shape=jax.ShapeDtypeStruct((B, C_OUT, Lp), jnp.float32),
        grid=(B,),
        in_specs=[
            pl.BlockSpec(memory_space=pltpu.MemorySpace.SMEM),        # alphas
            pl.BlockSpec((1, c_in, Lp), lambda b: (b, 0, 0)),         # feats
            pl.BlockSpec(kp["w_packed"].shape, lambda b: (0, 0, 0)),  # weights
            pl.BlockSpec(kp["b_packed"].shape, lambda b: (0, 0)),     # biases
        ],
        out_specs=pl.BlockSpec((1, C_OUT, Lp), lambda b: (b, 0, 0)),
        compiler_params=pltpu.CompilerParams(
            dimension_semantics=("parallel",)),
    )
    out = fn(kp["alphas"], feats, kp["w_packed"], kp["b_packed"])
    return out[:, :, :L]


# ------------------------------ JAX glue ---------------------------------------
def compute_standin_feats(x, w_feat):
    """Padding logic of WavLMAdapter.forward + a stand-in WavLM feature extractor.

    # TODO(synk): the frozen pretrained HuggingFace WavLM encoder has no
    # self-contained Pallas equivalent; a deterministic strided framing +
    # linear projection (a single strided conv) stands in for it.  It produces
    # exactly target_L frames, so the nearest-neighbour F.interpolate branch
    # of the original forward is a no-op here.
    """
    if x.ndim == 2:
        x = x[:, None, :]
    T = x.shape[-1]
    rem = T % DS_FACTOR
    extra = (DS_FACTOR - rem) if rem else 0
    x_pad = jnp.pad(x, ((0, 0), (0, 0), (PAD_LEFT, extra + PAD_RIGHT)))
    T_pad = x_pad.shape[-1]
    target_L = T_pad // DS_FACTOR - (OVERSAMPLE - 1)
    sig = x_pad[:, 0, :]
    frames = jnp.stack(
        [sig[:, i * DS_FACTOR: i * DS_FACTOR + N_FFT] for i in range(target_L)],
        axis=1)                                        # [B, target_L, N_FFT]
    return jnp.einsum("blf,fc->bcl", frames, w_feat)   # [B, C_IN, target_L]


def wavlm_adapter_forward(x, params):
    feats = compute_standin_feats(x, params["w_feat"])
    return adapter_pallas(feats, params["kernel"])


def init_params(key):
    ks = jax.random.split(key, 9)

    def cw(k, cout, cin, ksz):
        return 0.1 * jax.random.normal(k, (cout, cin, ksz), jnp.float32)

    def cb(k, cout):
        return 0.1 * jax.random.normal(k, (cout,), jnp.float32)

    torch_p = {
        "wp": cw(ks[0], C_OUT, C_IN, 3), "bp": cb(ks[1], C_OUT),
        "w1": cw(ks[2], C_OUT, C_OUT, 3), "b1": cb(ks[3], C_OUT),
        "w2": cw(ks[4], C_OUT, C_OUT, 3), "b2": cb(ks[5], C_OUT),
        "w3": cw(ks[6], C_OUT, C_OUT, 3), "b3": cb(ks[7], C_OUT),
        "alphas": jnp.full((3,), 0.25, jnp.float32),   # torch.nn.PReLU() default
    }

    def fuse(w):
        # torch (C_out, C_in, K) -> (C_out, K*C_in); tap k occupies columns
        # [k*C_in, (k+1)*C_in), matching concat([shift(-d), x, shift(+d)]).
        cout, cin, ksz = w.shape
        return jnp.transpose(w, (0, 2, 1)).reshape(cout, ksz * cin)

    # pack all fused weights into one lane-aligned block, all biases into one.
    wlanes = _round_up(3 * max(C_IN, C_OUT), LANE)
    w_packed = jnp.zeros((4, C_OUT, wlanes), jnp.float32)
    w_packed = w_packed.at[0, :, : 3 * C_IN].set(fuse(torch_p["wp"]))
    w_packed = w_packed.at[1, :, : 3 * C_OUT].set(fuse(torch_p["w1"]))
    w_packed = w_packed.at[2, :, : 3 * C_OUT].set(fuse(torch_p["w2"]))
    w_packed = w_packed.at[3, :, : 3 * C_OUT].set(fuse(torch_p["w3"]))
    b_packed = jnp.stack(
        [torch_p["bp"], torch_p["b1"], torch_p["b2"], torch_p["b3"]], axis=1)

    kernel_p = {"alphas": torch_p["alphas"],
                "w_packed": w_packed,
                "b_packed": b_packed}
    w_feat = 0.1 * jax.random.normal(ks[8], (N_FFT, C_IN), jnp.float32)
    return {"torch": torch_p, "kernel": kernel_p, "w_feat": w_feat}


# --------------------------- pure-JAX reference --------------------------------
def ref_adapter(feats, tp):
    def conv1d(x, w, b, d):
        K = w.shape[-1]
        pad = (K - 1) // 2 * d
        L = x.shape[-1]
        xp = jnp.pad(x, ((0, 0), (0, 0), (pad, pad)))
        out = jnp.broadcast_to(b[None, :, None],
                               (x.shape[0], w.shape[0], L)).astype(jnp.float32)
        for k in range(K):
            out = out + jnp.einsum("oi,bil->bol", w[:, :, k],
                                   xp[:, :, k * d: k * d + L], precision=HIGHEST)
        return out

    def prelu(x, a):
        return jnp.where(x >= 0, x, a * x)

    norm = jnp.sqrt(jnp.mean(jnp.sum(feats ** 2, axis=1, keepdims=True),
                             axis=2, keepdims=True))
    h = feats / jnp.maximum(norm, 1e-5)
    h = conv1d(h, tp["wp"], tp["bp"], 1)
    a = tp["alphas"]
    h = h + conv1d(prelu(h, a[0]), tp["w1"], tp["b1"], 1)
    h = h + conv1d(prelu(h, a[1]), tp["w2"], tp["b2"], 2)
    h = h + conv1d(prelu(h, a[2]), tp["w3"], tp["b3"], 4)
    return h


if __name__ == "__main__":
    key = jax.random.PRNGKey(0)
    kx, kparam = jax.random.split(key)
    B, T = 2, 512                               # x: [B, 1, T] waveform
    x = jax.random.normal(kx, (B, 1, T), jnp.float32)
    params = init_params(kparam)

    out = jax.block_until_ready(wavlm_adapter_forward(x, params))
    assert out.shape == (B, C_OUT, T // DS_FACTOR)

    feats = compute_standin_feats(x, params["w_feat"])
    ref = ref_adapter(feats, params["torch"])
    np.testing.assert_allclose(np.asarray(out), np.asarray(ref),
                               rtol=5e-4, atol=5e-4)
    print("KERNEL_OK")
</pallas_src>

<mosaic_0001>
module attributes {stable_mosaic.version = 11 : i64} {
  func.func @kernel(%arg0: i32, %arg1: memref<3xf32, #tpu.memory_space<smem>>, %arg2: memref<1x32x128xf32, #tpu.memory_space<vmem>>, %arg3: memref<4x8x128xf32, #tpu.memory_space<vmem>>, %arg4: memref<8x4xf32, #tpu.memory_space<vmem>>, %arg5: memref<1x8x128xf32, #tpu.memory_space<vmem>>) attributes {dimension_semantics = [#tpu.dimension_semantics<parallel>], iteration_bounds = array<i64: 2>, scalar_prefetch = 0 : i64, scratch_operands = 0 : i64, tpu.core_type = #tpu.core_type<tc>, window_params = [{transform_indices = @transform_0, window_bounds = array<i64: 3>}, {transform_indices = @transform_1, window_bounds = array<i64: 1, 32, 128>}, {pipeline_mode = #tpu.pipeline_mode<synchronous>, transform_indices = @transform_2, window_bounds = array<i64: 4, 8, 128>}, {pipeline_mode = #tpu.pipeline_mode<synchronous>, transform_indices = @transform_3, window_bounds = array<i64: 8, 4>}, {transform_indices = @transform_4, window_bounds = array<i64: 1, 8, 128>}]} {
    %c0 = arith.constant 0 : index
    %c0_0 = arith.constant 0 : index
    %c0_1 = arith.constant 0 : index
    %0 = vector.load %arg2[%c0, %c0_0, %c0_1] : memref<1x32x128xf32, #tpu.memory_space<vmem>>, vector<1x32x128xf32>
    %1 = vector.shape_cast %0 : vector<1x32x128xf32> to vector<32x128xf32>
    %2 = tpu.iota {dimensions = array<i32: 1>} : vector<1x128xi32>
    %3 = arith.mulf %1, %1 : vector<32x128xf32>
    %4 = vector.shape_cast %3 : vector<32x128xf32> to vector<1x32x128xf32>
    %cst = arith.constant dense<0.000000e+00> : vector<1xf32>
    %5 = vector.multi_reduction <add>, %4, %cst [1, 2] : vector<1x32x128xf32> to vector<1xf32>
    %6 = vector.shape_cast %5 : vector<1xf32> to vector<1x1x1xf32>
    %7 = vector.extract %6[0, 0, 0] : f32 from vector<1x1x1xf32>
    %cst_2 = arith.constant 3.125000e-02 : f32
    %8 = arith.mulf %7, %cst_2 : f32
    %cst_3 = arith.constant 1.000000e-10 : f32
    %9 = arith.maximumf %8, %cst_3 : f32
    %10 = math.rsqrt %9 : f32
    %11 = vector.broadcast %10 : f32 to vector<32x128xf32>
    %12 = arith.mulf %1, %11 : vector<32x128xf32>
    %c0_4 = arith.constant 0 : index
    %c0_5 = arith.constant 0 : index
    %c0_6 = arith.constant 0 : index
    %13 = vector.load %arg3[%c0_4, %c0_5, %c0_6] : memref<4x8x128xf32, #tpu.memory_space<vmem>>, vector<1x8x96xf32>
    %14 = vector.shape_cast %13 : vector<1x8x96xf32> to vector<8x96xf32>
    %c1 = arith.constant 1 : index
    %c0_7 = arith.constant 0 : index
    %c0_8 = arith.constant 0 : index
    %15 = vector.load %arg3[%c1, %c0_7, %c0_8] : memref<4x8x128xf32, #tpu.memory_space<vmem>>, vector<1x8x24xf32>
    %16 = vector.shape_cast %15 : vector<1x8x24xf32> to vector<8x24xf32>
    %c2 = arith.constant 2 : index
    %c0_9 = arith.constant 0 : index
    %c0_10 = arith.constant 0 : index
    %17 = vector.load %arg3[%c2, %c0_9, %c0_10] : memref<4x8x128xf32, #tpu.memory_space<vmem>>, vector<1x8x24xf32>
    %18 = vector.shape_cast %17 : vector<1x8x24xf32> to vector<8x24xf32>
    %c3 = arith.constant 3 : index
    %c0_11 = arith.constant 0 : index
    %c0_12 = arith.constant 0 : index
    %19 = vector.load %arg3[%c3, %c0_11, %c0_12] : memref<4x8x128xf32, #tpu.memory_space<vmem>>, vector<1x8x24xf32>
    %20 = vector.shape_cast %19 : vector<1x8x24xf32> to vector<8x24xf32>
    %c0_13 = arith.constant 0 : index
    %c0_14 = arith.constant 0 : index
    %21 = vector.load %arg4[%c0_13, %c0_14] : memref<8x4xf32, #tpu.memory_space<vmem>>, vector<8x1xf32>
    %c1_i32 = arith.constant 1 : i32
    %22 = tpu.dynamic_rotate %12 by %c1_i32 dim 1 : vector<32x128xf32>, i32 -> vector<32x128xf32>
    %c-1_i32 = arith.constant -1 : i32
    %23 = vector.broadcast %c-1_i32 : i32 to vector<1x128xi32>
    %24 = arith.addi %2, %23 : vector<1x128xi32>
    %c0_i32 = arith.constant 0 : i32
    %25 = vector.broadcast %c0_i32 : i32 to vector<1x128xi32>
    %26 = arith.cmpi sge, %24, %25 : vector<1x128xi32>
    %c-1_i32_15 = arith.constant -1 : i32
    %27 = vector.broadcast %c-1_i32_15 : i32 to vector<1x128xi32>
    %28 = arith.addi %2, %27 : vector<1x128xi32>
    %c32_i32 = arith.constant 32 : i32
    %29 = vector.broadcast %c32_i32 : i32 to vector<1x128xi32>
    %30 = arith.cmpi slt, %28, %29 : vector<1x128xi32>
    %31 = arith.andi %26, %30 : vector<1x128xi1>
    %cst_16 = arith.constant 0.000000e+00 : f32
    %32 = vector.shape_cast %31 : vector<1x128xi1> to vector<1x128xi1>
    %33 = vector.broadcast %32 : vector<1x128xi1> to vector<32x128xi1>
    %34 = vector.broadcast %cst_16 : f32 to vector<32x128xf32>
    %35 = arith.select %33, %22, %34 : vector<32x128xi1>, vector<32x128xf32>
    %c127_i32 = arith.constant 127 : i32
    %36 = tpu.dynamic_rotate %12 by %c127_i32 dim 1 : vector<32x128xf32>, i32 -> vector<32x128xf32>
    %c1_i32_17 = arith.constant 1 : i32
    %37 = vector.broadcast %c1_i32_17 : i32 to vector<1x128xi32>
    %38 = arith.addi %2, %37 : vector<1x128xi32>
    %c0_i32_18 = arith.constant 0 : i32
    %39 = vector.broadcast %c0_i32_18 : i32 to vector<1x128xi32>
    %40 = arith.cmpi sge, %38, %39 : vector<1x128xi32>
    %c1_i32_19 = arith.constant 1 : i32
    %41 = vector.broadcast %c1_i32_19 : i32 to vector<1x128xi32>
    %42 = arith.addi %2, %41 : vector<1x128xi32>
    %c32_i32_20 = arith.constant 32 : i32
    %43 = vector.broadcast %c32_i32_20 : i32 to vector<1x128xi32>
    %44 = arith.cmpi slt, %42, %43 : vector<1x128xi32>
    %45 = arith.andi %40, %44 : vector<1x128xi1>
    %cst_21 = arith.constant 0.000000e+00 : f32
    %46 = vector.shape_cast %45 : vector<1x128xi1> to vector<1x128xi1>
    %47 = vector.broadcast %46 : vector<1x128xi1> to vector<32x128xi1>
    %48 = vector.broadcast %cst_21 : f32 to vector<32x128xf32>
    %49 = arith.select %47, %36, %48 : vector<32x128xi1>, vector<32x128xf32>
    %50 = tpu.concatenate %35, %12, %49 in 0 : vector<32x128xf32>, vector<32x128xf32>, vector<32x128xf32> -> vector<96x128xf32>
    %cst_22 = arith.constant dense<0.000000e+00> : vector<8x128xf32>
    %51 = tpu.matmul %14, %50, %cst_22 {dimension_numbers = #tpu.dot_dimension_numbers<[1], [0], [0], [1], [0, 0, 1, 1], [], []>, precision = #tpu.contract_precision<fp32>} : vector<8x96xf32>, vector<96x128xf32>, vector<8x128xf32> -> vector<8x128xf32>
    %52 = vector.broadcast %21 : vector<8x1xf32> to vector<8x128xf32>
    %53 = arith.addf %51, %52 : vector<8x128xf32>
    %c0_23 = arith.constant 0 : index
    %54 = memref.load %arg1[%c0_23] : memref<3xf32, #tpu.memory_space<smem>>
    %cst_24 = arith.constant 0.000000e+00 : f32
    %55 = vector.broadcast %cst_24 : f32 to vector<8x128xf32>
    %56 = arith.cmpf oge, %53, %55 : vector<8x128xf32>
    %57 = vector.broadcast %54 : f32 to vector<8x128xf32>
    %58 = arith.mulf %57, %53 : vector<8x128xf32>
    %59 = arith.select %56, %53, %58 : vector<8x128xi1>, vector<8x128xf32>
    %c0_25 = arith.constant 0 : index
    %c1_26 = arith.constant 1 : index
    %60 = vector.load %arg4[%c0_25, %c1_26] : memref<8x4xf32, #tpu.memory_space<vmem>>, vector<8x1xf32>
    %c1_i32_27 = arith.constant 1 : i32
    %61 = tpu.dynamic_rotate %59 by %c1_i32_27 dim 1 : vector<8x128xf32>, i32 -> vector<8x128xf32>
    %c-1_i32_28 = arith.constant -1 : i32
    %62 = vector.broadcast %c-1_i32_28 : i32 to vector<1x128xi32>
    %63 = arith.addi %2, %62 : vector<1x128xi32>
    %c0_i32_29 = arith.constant 0 : i32
    %64 = vector.broadcast %c0_i32_29 : i32 to vector<1x128xi32>
    %65 = arith.cmpi sge, %63, %64 : vector<1x128xi32>
    %c-1_i32_30 = arith.constant -1 : i32
    %66 = vector.broadcast %c-1_i32_30 : i32 to vector<1x128xi32>
    %67 = arith.addi %2, %66 : vector<1x128xi32>
    %c32_i32_31 = arith.constant 32 : i32
    %68 = vector.broadcast %c32_i32_31 : i32 to vector<1x128xi32>
    %69 = arith.cmpi slt, %67, %68 : vector<1x128xi32>
    %70 = arith.andi %65, %69 : vector<1x128xi1>
    %cst_32 = arith.constant 0.000000e+00 : f32
    %71 = vector.shape_cast %70 : vector<1x128xi1> to vector<1x128xi1>
    %72 = vector.broadcast %71 : vector<1x128xi1> to vector<8x128xi1>
    %73 = vector.broadcast %cst_32 : f32 to vector<8x128xf32>
    %74 = arith.select %72, %61, %73 : vector<8x128xi1>, vector<8x128xf32>
    %c127_i32_33 = arith.constant 127 : i32
    %75 = tpu.dynamic_rotate %59 by %c127_i32_33 dim 1 : vector<8x128xf32>, i32 -> vector<8x128xf32>
    %c1_i32_34 = arith.constant 1 : i32
    %76 = vector.broadcast %c1_i32_34 : i32 to vector<1x128xi32>
    %77 = arith.addi %2, %76 : vector<1x128xi32>
    %c0_i32_35 = arith.constant 0 : i32
    %78 = vector.broadcast %c0_i32_35 : i32 to vector<1x128xi32>
    %79 = arith.cmpi sge, %77, %78 : vector<1x128xi32>
    %c1_i32_36 = arith.constant 1 : i32
    %80 = vector.broadcast %c1_i32_36 : i32 to vector<1x128xi32>
    %81 = arith.addi %2, %80 : vector<1x128xi32>
    %c32_i32_37 = arith.constant 32 : i32
    %82 = vector.broadcast %c32_i32_37 : i32 to vector<1x128xi32>
    %83 = arith.cmpi slt, %81, %82 : vector<1x128xi32>
    %84 = arith.andi %79, %83 : vector<1x128xi1>
    %cst_38 = arith.constant 0.000000e+00 : f32
    %85 = vector.shape_cast %84 : vector<1x128xi1> to vector<1x128xi1>
    %86 = vector.broadcast %85 : vector<1x128xi1> to vector<8x128xi1>
    %87 = vector.broadcast %cst_38 : f32 to vector<8x128xf32>
    %88 = arith.select %86, %75, %87 : vector<8x128xi1>, vector<8x128xf32>
    %89 = tpu.concatenate %74, %59, %88 in 0 : vector<8x128xf32>, vector<8x128xf32>, vector<8x128xf32> -> vector<24x128xf32>
    %cst_39 = arith.constant dense<0.000000e+00> : vector<8x128xf32>
    %90 = tpu.matmul %16, %89, %cst_39 {dimension_numbers = #tpu.dot_dimension_numbers<[1], [0], [0], [1], [0, 0, 1, 1], [], []>, precision = #tpu.contract_precision<fp32>} : vector<8x24xf32>, vector<24x128xf32>, vector<8x128xf32> -> vector<8x128xf32>
    %91 = vector.broadcast %60 : vector<8x1xf32> to vector<8x128xf32>
    %92 = arith.addf %90, %91 : vector<8x128xf32>
    %93 = arith.addf %53, %92 : vector<8x128xf32>
    %c1_40 = arith.constant 1 : index
    %94 = memref.load %arg1[%c1_40] : memref<3xf32, #tpu.memory_space<smem>>
    %cst_41 = arith.constant 0.000000e+00 : f32
    %95 = vector.broadcast %cst_41 : f32 to vector<8x128xf32>
    %96 = arith.cmpf oge, %93, %95 : vector<8x128xf32>
    %97 = vector.broadcast %94 : f32 to vector<8x128xf32>
    %98 = arith.mulf %97, %93 : vector<8x128xf32>
    %99 = arith.select %96, %93, %98 : vector<8x128xi1>, vector<8x128xf32>
    %c0_42 = arith.constant 0 : index
    %c2_43 = arith.constant 2 : index
    %100 = vector.load %arg4[%c0_42, %c2_43] : memref<8x4xf32, #tpu.memory_space<vmem>>, vector<8x1xf32>
    %c2_i32 = arith.constant 2 : i32
    %101 = tpu.dynamic_rotate %99 by %c2_i32 dim 1 : vector<8x128xf32>, i32 -> vector<8x128xf32>
    %c-2_i32 = arith.constant -2 : i32
    %102 = vector.broadcast %c-2_i32 : i32 to vector<1x128xi32>
    %103 = arith.addi %2, %102 : vector<1x128xi32>
    %c0_i32_44 = arith.constant 0 : i32
    %104 = vector.broadcast %c0_i32_44 : i32 to vector<1x128xi32>
    %105 = arith.cmpi sge, %103, %104 : vector<1x128xi32>
    %c-2_i32_45 = arith.constant -2 : i32
    %106 = vector.broadcast %c-2_i32_45 : i32 to vector<1x128xi32>
    %107 = arith.addi %2, %106 : vector<1x128xi32>
    %c32_i32_46 = arith.constant 32 : i32
    %108 = vector.broadcast %c32_i32_46 : i32 to vector<1x128xi32>
    %109 = arith.cmpi slt, %107, %108 : vector<1x128xi32>
    %110 = arith.andi %105, %109 : vector<1x128xi1>
    %cst_47 = arith.constant 0.000000e+00 : f32
    %111 = vector.shape_cast %110 : vector<1x128xi1> to vector<1x128xi1>
    %112 = vector.broadcast %111 : vector<1x128xi1> to vector<8x128xi1>
    %113 = vector.broadcast %cst_47 : f32 to vector<8x128xf32>
    %114 = arith.select %112, %101, %113 : vector<8x128xi1>, vector<8x128xf32>
    %c126_i32 = arith.constant 126 : i32
    %115 = tpu.dynamic_rotate %99 by %c126_i32 dim 1 : vector<8x128xf32>, i32 -> vector<8x128xf32>
    %c2_i32_48 = arith.constant 2 : i32
    %116 = vector.broadcast %c2_i32_48 : i32 to vector<1x128xi32>
    %117 = arith.addi %2, %116 : vector<1x128xi32>
    %c0_i32_49 = arith.constant 0 : i32
    %118 = vector.broadcast %c0_i32_49 : i32 to vector<1x128xi32>
    %119 = arith.cmpi sge, %117, %118 : vector<1x128xi32>
    %c2_i32_50 = arith.constant 2 : i32
    %120 = vector.broadcast %c2_i32_50 : i32 to vector<1x128xi32>
    %121 = arith.addi %2, %120 : vector<1x128xi32>
    %c32_i32_51 = arith.constant 32 : i32
    %122 = vector.broadcast %c32_i32_51 : i32 to vector<1x128xi32>
    %123 = arith.cmpi slt, %121, %122 : vector<1x128xi32>
    %124 = arith.andi %119, %123 : vector<1x128xi1>
    %cst_52 = arith.constant 0.000000e+00 : f32
    %125 = vector.shape_cast %124 : vector<1x128xi1> to vector<1x128xi1>
    %126 = vector.broadcast %125 : vector<1x128xi1> to vector<8x128xi1>
    %127 = vector.broadcast %cst_52 : f32 to vector<8x128xf32>
    %128 = arith.select %126, %115, %127 : vector<8x128xi1>, vector<8x128xf32>
    %129 = tpu.concatenate %114, %99, %128 in 0 : vector<8x128xf32>, vector<8x128xf32>, vector<8x128xf32> -> vector<24x128xf32>
    %cst_53 = arith.constant dense<0.000000e+00> : vector<8x128xf32>
    %130 = tpu.matmul %18, %129, %cst_53 {dimension_numbers = #tpu.dot_dimension_numbers<[1], [0], [0], [1], [0, 0, 1, 1], [], []>, precision = #tpu.contract_precision<fp32>} : vector<8x24xf32>, vector<24x128xf32>, vector<8x128xf32> -> vector<8x128xf32>
    %131 = vector.broadcast %100 : vector<8x1xf32> to vector<8x128xf32>
    %132 = arith.addf %130, %131 : vector<8x128xf32>
    %133 = arith.addf %93, %132 : vector<8x128xf32>
    %c2_54 = arith.constant 2 : index
    %134 = memref.load %arg1[%c2_54] : memref<3xf32, #tpu.memory_space<smem>>
    %cst_55 = arith.constant 0.000000e+00 : f32
    %135 = vector.broadcast %cst_55 : f32 to vector<8x128xf32>
    %136 = arith.cmpf oge, %133, %135 : vector<8x128xf32>
    %137 = vector.broadcast %134 : f32 to vector<8x128xf32>
    %138 = arith.mulf %137, %133 : vector<8x128xf32>
    %139 = arith.select %136, %133, %138 : vector<8x128xi1>, vector<8x128xf32>
    %c0_56 = arith.constant 0 : index
    %c3_57 = arith.constant 3 : index
    %140 = vector.load %arg4[%c0_56, %c3_57] : memref<8x4xf32, #tpu.memory_space<vmem>>, vector<8x1xf32>
    %c4_i32 = arith.constant 4 : i32
    %141 = tpu.dynamic_rotate %139 by %c4_i32 dim 1 : vector<8x128xf32>, i32 -> vector<8x128xf32>
    %c-4_i32 = arith.constant -4 : i32
    %142 = vector.broadcast %c-4_i32 : i32 to vector<1x128xi32>
    %143 = arith.addi %2, %142 : vector<1x128xi32>
    %c0_i32_58 = arith.constant 0 : i32
    %144 = vector.broadcast %c0_i32_58 : i32 to vector<1x128xi32>
    %145 = arith.cmpi sge, %143, %144 : vector<1x128xi32>
    %c-4_i32_59 = arith.constant -4 : i32
    %146 = vector.broadcast %c-4_i32_59 : i32 to vector<1x128xi32>
    %147 = arith.addi %2, %146 : vector<1x128xi32>
    %c32_i32_60 = arith.constant 32 : i32
    %148 = vector.broadcast %c32_i32_60 : i32 to vector<1x128xi32>
    %149 = arith.cmpi slt, %147, %148 : vector<1x128xi32>
    %150 = arith.andi %145, %149 : vector<1x128xi1>
    %cst_61 = arith.constant 0.000000e+00 : f32
    %151 = vector.shape_cast %150 : vector<1x128xi1> to vector<1x128xi1>
    %152 = vector.broadcast %151 : vector<1x128xi1> to vector<8x128xi1>
    %153 = vector.broadcast %cst_61 : f32 to vector<8x128xf32>
    %154 = arith.select %152, %141, %153 : vector<8x128xi1>, vector<8x128xf32>
    %c124_i32 = arith.constant 124 : i32
    %155 = tpu.dynamic_rotate %139 by %c124_i32 dim 1 : vector<8x128xf32>, i32 -> vector<8x128xf32>
    %c4_i32_62 = arith.constant 4 : i32
    %156 = vector.broadcast %c4_i32_62 : i32 to vector<1x128xi32>
    %157 = arith.addi %2, %156 : vector<1x128xi32>
    %c0_i32_63 = arith.constant 0 : i32
    %158 = vector.broadcast %c0_i32_63 : i32 to vector<1x128xi32>
    %159 = arith.cmpi sge, %157, %158 : vector<1x128xi32>
    %c4_i32_64 = arith.constant 4 : i32
    %160 = vector.broadcast %c4_i32_64 : i32 to vector<1x128xi32>
    %161 = arith.addi %2, %160 : vector<1x128xi32>
    %c32_i32_65 = arith.constant 32 : i32
    %162 = vector.broadcast %c32_i32_65 : i32 to vector<1x128xi32>
    %163 = arith.cmpi slt, %161, %162 : vector<1x128xi32>
    %164 = arith.andi %159, %163 : vector<1x128xi1>
    %cst_66 = arith.constant 0.000000e+00 : f32
    %165 = vector.shape_cast %164 : vector<1x128xi1> to vector<1x128xi1>
    %166 = vector.broadcast %165 : vector<1x128xi1> to vector<8x128xi1>
    %167 = vector.broadcast %cst_66 : f32 to vector<8x128xf32>
    %168 = arith.select %166, %155, %167 : vector<8x128xi1>, vector<8x128xf32>
    %169 = tpu.concatenate %154, %139, %168 in 0 : vector<8x128xf32>, vector<8x128xf32>, vector<8x128xf32> -> vector<24x128xf32>
    %cst_67 = arith.constant dense<0.000000e+00> : vector<8x128xf32>
    %170 = tpu.matmul %20, %169, %cst_67 {dimension_numbers = #tpu.dot_dimension_numbers<[1], [0], [0], [1], [0, 0, 1, 1], [], []>, precision = #tpu.contract_precision<fp32>} : vector<8x24xf32>, vector<24x128xf32>, vector<8x128xf32> -> vector<8x128xf32>
    %171 = vector.broadcast %140 : vector<8x1xf32> to vector<8x128xf32>
    %172 = arith.addf %170, %171 : vector<8x128xf32>
    %173 = arith.addf %133, %172 : vector<8x128xf32>
    %c0_68 = arith.constant 0 : index
    %c0_69 = arith.constant 0 : index
    %c0_70 = arith.constant 0 : index
    %174 = vector.load %arg5[%c0_68, %c0_69, %c0_70] : memref<1x8x128xf32, #tpu.memory_space<vmem>>, vector<1x8x128xf32>
    %175 = vector.shape_cast %174 : vector<1x8x128xf32> to vector<8x128xf32>
    %176 = vector.shape_cast %173 : vector<8x128xf32> to vector<1x8x128xf32>
    tpu.vector_store %arg5[%c0_68, %c0_69, %c0_70], %176 {strides = array<i32>} : memref<1x8x128xf32, #tpu.memory_space<vmem>>, vector<1x8x128xf32>,
    return
  }
  func.func @transform_0(%arg0: i32) -> i32 {
    %c0_i32 = arith.constant 0 : i32
    %c0_i32_0 = arith.constant 0 : i32
    return %c0_i32 : i32
  }
  func.func @transform_1(%arg0: i32) -> (i32, i32, i32) {
    %c0_i32 = arith.constant 0 : i32
    %c0_i32_0 = arith.constant 0 : i32
    %c0_i32_1 = arith.constant 0 : i32
    return %arg0, %c0_i32, %c0_i32_0 : i32, i32, i32
  }
  func.func @transform_2(%arg0: i32) -> (i32, i32, i32) {
    %c0_i32 = arith.constant 0 : i32
    %c0_i32_0 = arith.constant 0 : i32
    %c0_i32_1 = arith.constant 0 : i32
    %c0_i32_2 = arith.constant 0 : i32
    return %c0_i32, %c0_i32_0, %c0_i32_1 : i32, i32, i32
  }
  func.func @transform_3(%arg0: i32) -> (i32, i32) {
    %c0_i32 = arith.constant 0 : i32
    %c0_i32_0 = arith.constant 0 : i32
    %c0_i32_1 = arith.constant 0 : i32
    return %c0_i32, %c0_i32_0 : i32, i32
  }
  func.func @transform_4(%arg0: i32) -> (i32, i32, i32) {
    %c0_i32 = arith.constant 0 : i32
    %c0_i32_0 = arith.constant 0 : i32
    %c0_i32_1 = arith.constant 0 : i32
    return %arg0, %c0_i32, %c0_i32_0 : i32, i32, i32
  }
}

</mosaic_0001>

<bundles_post_ra>
// kernel: tpu_custom_call.1
= control target key start
LH: loop header
LB: loop body
LE: loop exit
PB: predicated region body
PF: predicated region fallthrough
CT: control target
= control target key end

     0   :  { %s4034_s0 = inlined_call_operand.vmem [shape: f32[3], index: 0, kind: input, shape index: {}]   ;;  %s4035_s1 = inlined_call_operand.hbm [shape: f32[2,32,128], index: 1, kind: input, shape index: {}]   ;;  %s4036_s2 = inlined_call_operand.hbm [shape: f32[4,8,128], index: 2, kind: input, shape index: {}]   ;;  %s4037_s3 = inlined_call_operand.vmem [shape: f32[8,4], index: 3, kind: input, shape index: {}]   ;;  %s4038_s4 = inlined_call_operand.hbm [shape: f32[2,8,128], index: 4, kind: output, shape index: {}]  }
   0x1   :  { %4042 = sst [smem:[#allocation14_spill]] %s4034_s0 }
   0x2   :  { %9 = vsyncpa [#allocation5], 0 }
   0x3   :  { %10 = vsyncpa [#allocation3], 0 }
   0x4   :  { %12 = vsyncpa [#allocation3 + $0x1], 0 }
   0x5   :  { %13 = vsyncpa [#allocation8], 0 }
   0x6   :  { %14 = vsyncpa [#allocation4], 0 }
   0x7   :  { %16 = vsyncpa [#allocation4 + $0x1], 0  ;;  %s3477_s15 = smov 0   ;;  %s3479_s16 = smov 0  }
   0x8   :  { %s3481_s17 = smov 0   ;;  %s3483_s18 = smov 0  }
   0x9 LB: > { %s3498_s19 = sadd.s32 4294967295, %s3430_s18   ;;  %s2524_s20 = sadd.s32 4294967294, %s3430_s18   ;;  %s3430_s18 = sphi %s3483_s18, %s4064_s18   ;;  %s3426_s17 = sphi %s3481_s17, %s4063_s17   ;;  %s3422_s16 = sphi %s3479_s16, %s4062_s16   ;;  %s3418_s15 = sphi %s3477_s15, %s4061_s15  }
   0xa   : > { %s3502_s21 = sadd.s32 1, %s3430_s18   ;;  %s50_s22 = sadd.s32 1, %s3426_s17 }
   0xb   : > { %s47_s23 = ssub.s32 %s3430_s18, %s3502_s21  ;;  %p57_p0 = scmp.ne.s32.totalorder %s3426_s17, %s3422_s16 }
   0xc   : > { %p48_p1 = scmp.eq.s32.totalorder %s47_s23, 0  ;;  %p58_p2 = scmp.eq.s32.totalorder %s3430_s18, 0 }
   0xd   : > { %p63_p3 = scmp.ne.s32.totalorder %s3422_s16, %s3418_s15  ;;  %p4039_p4 = scmp.eq.s32.totalorder %s3498_s19, 0 }
   0xe   : > { %s3514_s24 = scalar_select %p48_p1, %s3426_s17, %s50_s22  }
   0xf   : > { %p3516_p5 = por %p58_p2, %p57_p0  ;;  %p3522_p6 = por %p4039_p4, %p63_p3 }
  0x10   : > { %p129_p7 = scmp.eq.s32.totalorder %s3498_s19, 1  ;;  %p135_p8 = scmp.eq.s32.totalorder %s2524_s20, 1 }
  0x11   : > { %s4044_s26 = scalar_select %p3522_p6, 1, 0 }
  0x12   : > { %p2525_p9 = scmp.ge.s32.totalorder %s3430_s18, 1  ;;  %p142_p10 = scmp.lt.s32.totalorder %s3430_s18, 3 }
  0x13   : > { %p3529_p11 = por %p129_p7, %p57_p0  ;;  %p3533_p12 = por %p135_p8, %p63_p3 }
  0x14   : > { %p3537_p13 = pnand %p2525_p9, %p142_p10  ;;  %s4048_s0 = sld [smem:[#allocation14_spill]] }
  0x15   : > { %s4045_s27 = scalar_select %p3529_p11, 1, 0 }
  0x16   : > { %s4046_s28 = scalar_select %p3533_p12, 1, 0 }
  0x17   : > { %p3206_p1 = pneg %p3537_p13  ;;  %p3223_p2 = scmp.lt.s32.totalorder %s3430_s18, 2 }
  0x18   : > { %s3432_s9 = smov [#allocation7]  }
  0x19   : > { %p3550_p7 = pnand %p3206_p1, %p4039_p4  ;;  %p3556_p3 = pnand %p3223_p2, %p3516_p5 }
  0x1a   : > { %s155_s6 = sshll.u32 %s4048_s0, 4  ;;  %s165_s10 = sshll.u32 %s3432_s9, 4  ;;  %s156_s6 = int_to_ptr.vmem [resolvable:$true] %s155_s6  ;;  %s3560_s10 = int_to_ptr.vmem [resolvable:$true] %s165_s10 }
  0x1b   : > { %s3283_s11 = scalar_lea.vmem %s156_s6, 16  ;;  %p3285_p9 = pneg %p3550_p7 }
  0x1c   : > { %p3284_p8 = scmp.ne.s32.totalorder %s156_s6, %s3283_s11  ;;  %p3291_p0 = scmp.lt.s32.totalorder %s156_s6, %s156_s6 }
  0x1d   : > { %p3292_p4 = scmp.lt.s32.totalorder %s3283_s11, %s3283_s11 }
  0x1e   : > { %p3286_p10 = pnand %p3285_p9, %p3284_p8 }
  0x1f   : > { %p3293_p12 = por %p3292_p4, %p3291_p0 }
  0x20   : > { %p3287_p1 = pneg %p3286_p10 }
  0x22   : > { %p3294_p11 = pnand %p3293_p12, %p3287_p1 }
  0x24   : > { %3297 = shalt.err (!%p3294_p11)
}
  0x25   : > { %s3433_s12 = smov [#allocation2]   ;;  %s182_s13 = sand.u32 1, %s3426_s17  }
  0x26   : > { %3209 = dma.vmem_to_smem (!%p3550_p7), %s156_s6, 16, %s3433_s12, [#allocation5]  }
  0x27   : > { %s3298_s22 = scalar_lea.hbm %s4036_s2, 512 }
  0x28   : > { %p3299_p5 = scmp.ne.s32.totalorder %s4036_s2, %s3298_s22  ;;  %p3305_p11 = scmp.lt.u32.totalorder %s3298_s22, %s4036_s2 }
  0x2a   : > { %p3301_p4 = pnand %p3299_p5, %p3285_p9 }
  0x2c   : > { %p3302_p12 = pneg %p3301_p4 }
  0x2e   : > { %p3307_p0 = pnand %p3305_p11, %p3302_p12 }
  0x30   : > { %3310 = shalt.err (!%p3307_p0)
}
  0x31   : > { %s3311_s6 = scalar_lea.vmem %s3560_s10, 512  ;;  %p3319_p1 = scmp.lt.s32.totalorder %s3560_s10, %s3560_s10 }
  0x32   : > { %p3312_p2 = scmp.ne.s32.totalorder %s3560_s10, %s3311_s6  ;;  %p3320_p5 = scmp.lt.s32.totalorder %s3311_s6, %s3311_s6 }
  0x34   : > { %p3314_p8 = pnand %p3312_p2, %p3285_p9  ;;  %p3321_p4 = por %p3320_p5, %p3319_p1 }
  0x36   : > { %p3315_p10 = pneg %p3314_p8 }
  0x38   : > { %p3322_p6 = pnand %p3321_p4, %p3315_p10 }
  0x3a   : > { %3325 = shalt.err (!%p3322_p6)
}
  0x3b   : > { %s3434_s9 = smov 128   ;;  %s3435_s11 = smov 8  }
  0x3c   : > { %3212 = dma.hbm_to_vmem [thread:$0]  (!%p3550_p7), %s4036_s2, 512, %s3560_s10, [#allocation8], %s3434_s9, %s3434_s9, %s3435_s11  }
  0x3d   : > { %s2529_s20 = sshll.u32 %s182_s13, 5  ;;  %s2543_s22 = sshll.u32 %s3430_s18, 9 }
  0x3e   : > { %s3602_s30 = scalar_lea.hbm %s4035_s1, %s2543_s22  ;;  %s186_s5 = scalar_lea.vmem [#allocation6], %s2529_s20 }
  0x3f   : > { %s193_s7 = sshll.u32 %s186_s5, 4  ;;  %s3606_s6 = scalar_lea.sflag [#allocation3], %s182_s13  ;;  %s3604_s7 = int_to_ptr.vmem [resolvable:$true] %s193_s7 }
  0x40   : > { %s3326_s0 = scalar_lea.hbm %s3602_s30, 512  ;;  %p3328_p7 = pneg %p3556_p3 }
  0x41   : > { %p3327_p6 = scmp.ne.s32.totalorder %s3602_s30, %s3326_s0  ;;  %s3331_s14 = scalar_lea.hbm %s4035_s1, 1024 }
  0x42   : > { %p3332_p11 = scmp.lt.u32.totalorder %s3602_s30, %s4035_s1  ;;  %p3333_p0 = scmp.lt.u32.totalorder %s3331_s14, %s3326_s0 }
  0x43   : > { %p3329_p9 = pnand %p3328_p7, %p3327_p6  ;;  %p3335_p8 = scmp.lt.u32.totalorder %s3326_s0, %s3602_s30 }
  0x44   : > { %p3334_p2 = por %p3333_p0, %p3332_p11 }
  0x45   : > { %p3330_p12 = pneg %p3329_p9 }
  0x46   : > { %p3336_p10 = por %p3335_p8, %p3334_p2 }
  0x48   : > { %p3337_p1 = pnand %p3336_p10, %p3330_p12 }
  0x4a   : > { %3340 = shalt.err (!%p3337_p1)
}
  0x4b   : > { %s3341_s13 = scalar_lea.vmem %s3604_s7, 512  ;;  %s3436_s20 = smov [#allocation6]  }
  0x4c   : > { %p3342_p5 = scmp.ne.s32.totalorder %s3604_s7, %s3341_s13  ;;  %s3346_s25 = sshll.u32 %s3436_s20, 4  ;;  %s3347_s25 = int_to_ptr.vmem [resolvable:$false] %s3346_s25 }
  0x4d   : > { %s3348_s5 = scalar_lea.vmem %s3347_s25, 1024  ;;  %p3349_p9 = scmp.lt.s32.totalorder %s3604_s7, %s3347_s25 }
  0x4e   : > { %p3344_p4 = pnand %p3342_p5, %p3328_p7  ;;  %p3350_p11 = scmp.lt.s32.totalorder %s3348_s5, %s3341_s13 }
  0x50   : > { %p3345_p6 = pneg %p3344_p4  ;;  %p3351_p0 = por %p3350_p11, %p3349_p9 }
  0x52   : > { %p3352_p2 = pnand %p3351_p0, %p3345_p6 }
  0x54   : > { %3355 = shalt.err (!%p3352_p2)
}
  0x55   : > { %3216 = dma.hbm_to_vmem [thread:$0]  (!%p3556_p3), %s3602_s30, 512, %s3604_s7, %s3606_s6, %s3434_s9, %s3434_s9, %s3435_s11  }
  0x56   : > { %205 = sbr.rel (%p3537_p13) target bundleno = 1991 (0x7c7), region = 36  ;;  %p4051_p7 = scmp.eq.s32.totalorder (!%p3537_p13), %s3498_s19, 0 }
  0x5d   : > { %3401 = dma.done.wait (%p4051_p7), [#allocation5], 16   ;;  %p4052_p12 = pmov %p4051_p7 }
  0x5e   : > { %s3644_s0 = sand.u32 1, %s3422_s16   ;;  %p4053_p8 = scmp.ne.s32.totalorder %s4044_s26, 0 }
  0x5f   : > { %3403 = vsyncadd (%p4052_p12), [#allocation5], 4294967280  ;;  %s2534_s8 = sshll.u32 %s3644_s0, 5  ;;  %s212_s10 = scalar_lea.sflag [#allocation3], %s3644_s0 }
  0x60   : > { %s215_s12 = scalar_lea.vmem [#allocation6], %s2534_s8 }
  0x61   : > { %3405 = dma.done.wait (%p4053_p8), %s212_s10, 512  }
  0x62   : > { %3407 = vsyncadd (%p4053_p8), %s212_s10, 4294966784  ;;  %p4054_p13 = pmov %p4051_p7 }
  0x63   : > { %p4055_p3 = pmov %p4051_p7 }
  0x64   : > { %3409 = dma.done.wait (%p4054_p13), [#allocation8], 512  }
  0x65   : > { %3411 = vsyncadd (%p4055_p3), [#allocation8], 4294966784 }
  0x66   : > { %224 = sfence }
  0x67   : > { %v245_v0 = vld [vmem:[%s215_s12] sm:$0xff]  ;;  %v246_v1 = vld [vmem:[%s215_s12 + $0x8] sm:$0xff]  ;;  %v247_v2 = vld [vmem:[%s215_s12 + $0x10] sm:$0xff]  ;;  %s3437_s9 = smov 1e-10   ;;  %v3438_v20 = vmov 0.0|0.0   ;;  %v249_v55 = vlaneseq }
  0x68   : > { %v248_v3 = vld [vmem:[%s215_s12 + $0x18] sm:$0xff]  ;;  %v251_v4 = vmul.f32 %v245_v0, %v245_v0  ;;  %v252_v5 = vmul.f32 %v246_v1, %v246_v1  ;;  %v253_v6 = vmul.f32 %v247_v2, %v247_v2  ;;  %3018 = vmatprep.subr.bf16.mxu1 %v3438_v20  ;;  %3036 = vmatprep.subr.bf16.mxu0 %v3438_v20  ;;  %s3439_s7 = smov 1   ;;  %s3440_s6 = smov 127   ;;  %vm3441_vm0 = vmmov 0  }
  0x69   : > { %v254_v7 = vmul.f32 %v248_v3, %v248_v3  ;;  %v3442_v54 = vmov 0.0   ;;  %v3702_v56 = vand.u32 127, %v249_v55  ;;  %vm326_vm5 = vcmask 785408   ;;  %s919_s23 = sld [smem:[#allocation2]]  ;;  %s2537_s13 = sld [smem:[#allocation2 + $0x1]] }
  0x6a   : > { %v255_v8 = vadd.f32 %v252_v5, %v251_v4  ;;  %2745 = vmatprep.mubr.msk.f32.mxu0 %vm3441_vm0, %v3442_v54  ;;  %2718 = vmatprep.mubr.msk.f32.mxu1 %vm3441_vm0, %v3442_v54  ;;  %vm934_vm7 = vcmask 195584   ;;  %s3445_s20 = smov 2   ;;  %s3446_s25 = smov 126  }
  0x6b   : > { %v293_v57 = vadd.s32 4294967295, %v3702_v56  ;;  %s2538_s5 = sld [smem:[#allocation2 + $0x2]]  ;;  %s3448_s8 = smov 4  }
  0x6c   : > { %v256_v9 = vadd.f32 %v255_v8, %v253_v6  ;;  %v3722_v6 = vadd.s32 1, %v3702_v56  ;;  %s3449_s10 = smov 124   ;;  %s2536_s12 = sshll.u32 %s3644_s0, 3 }
  0x6d   : > { %vm294_vm1 = vcmp.ge.s32.totalorder %v293_v57, 0  ;;  %vm295_vm2 = vcmp.lt.s32.totalorder %v293_v57, 32  ;;  %p4058_p1 = scmp.ne.s32.totalorder %s4045_s27, 0 }
  0x6e   : > { %v257_v10 = vadd.f32 %v256_v9, %v254_v7  ;;  %vm3705_vm3 = vmand %vm294_vm1, %vm295_vm2  ;;  %vm313_vm4 = vcmp.lt.s32.totalorder %v3722_v6, 32 }
  0x70   : > { %258 = vadd.xlane.f32.xlu0 %v257_v10 }
  0xfd   : > { %v259_v11 = vpop.xlane.xlu0 %258 }
  0xfe   : > { %v260_v12 = vrot.slane %v259_v11, 4 }
 0x100   : > { %v261_v13 = vadd.f32 %v260_v12, %v259_v11 }
 0x102   : > { %v262_v14 = vrot.slane %v261_v13, 2 }
 0x104   : > { %v263_v15 = vadd.f32 %v262_v14, %v261_v13 }
 0x106   : > { %v264_v16 = vrot.slane %v263_v15, 1 }
 0x108   : > { %v265_v17 = vadd.f32 %v264_v16, %v263_v15  ;;  %v3740_v16 = vld [vmem:[%s4037_s3] sm:$0xff] }
 0x10a   : > { %3190 = vpush %v265_v17 }
 0x13b   : > { %s3191_s26 = spop %3190 }
 0x13c   : > { %s267_s29 = smul.f32 0.03125, %s3191_s26  ;;  %s2540_s26 = sshll.u32 %s3498_s19, 7 }
 0x13d   : > { %s3451_s19 = smov [#allocation9]  }
 0x13e   : > { %s268_s11 = smax.f32 %s3437_s9, %s267_s29  ;;  %s244_s29 = scalar_lea.vmem [#allocation9], %s2536_s12 }
 0x13f   : > { %v269_v18 = vstv %s268_s11  ;;  %s2432_s9 = sshll.u32 %s244_s29, 4  ;;  %s3360_s22 = sshll.u32 %s3451_s19, 4  ;;  %s3992_s9 = int_to_ptr.vmem [resolvable:$true] %s2432_s9  ;;  %s3361_s22 = int_to_ptr.vmem [resolvable:$false] %s3360_s22 }
 0x140   : > { %3281 = vrsqrt.f32 %v269_v18  ;;  %s3356_s14 = scalar_lea.vmem %s3992_s9, 128  ;;  %p3363_p6 = scmp.lt.s32.totalorder %s3992_s9, %s3361_s22 }
 0x141   : > { %p3357_p10 = scmp.ne.s32.totalorder %s3992_s9, %s3356_s14 }
 0x143   : > { %p3358_p5 = pnand %p3357_p10, %p4058_p1 }
 0x145   : > { %p3359_p4 = pneg %p3358_p5 }
 0x14a   : > { %v3282_v19 = vpop.eup %3281 }
 0x14b   : > { %3192 = vpush %v3282_v19 }
 0x17c   : > { %s3193_s30 = spop %3192 }
 0x17d   : > { %v272_v21 = vstv %s3193_s30 }
 0x17e   : > { %v273_v22 = vmul.f32 %v272_v21, %v245_v0  ;;  %v274_v23 = vmul.f32 %v272_v21, %v246_v1  ;;  %v275_v24 = vmul.f32 %v272_v21, %v247_v2  ;;  %v276_v25 = vmul.f32 %v272_v21, %v248_v3 }
 0x180   : > { %287 = vrot.lane.b32.xlu1 %v274_v23, %s3439_s7  ;;  %285 = vrot.lane.b32.xlu0 %v273_v22, %s3439_s7  ;;  %v343_v26 = vand.u32 4294901760, %v273_v22  ;;  %v346_v27 = vand.u32 4294901760, %v274_v23  ;;  %v349_v28 = vand.u32 4294901760, %v275_v24  ;;  %v352_v29 = vand.u32 4294901760, %v276_v25 }
 0x182   : > { %v3660_v30 = vpack.c.bf16 %v346_v27, %v343_v26  ;;  %v3662_v31 = vsub.f32 %v273_v22, %v343_v26  ;;  %v3664_v32 = vsub.f32 %v274_v23, %v346_v27  ;;  %v3666_v33 = vpack.c.bf16 %v352_v29, %v349_v28 }
 0x183   : > { %v3668_v34 = vsub.f32 %v275_v24, %v349_v28  ;;  %v3670_v35 = vsub.f32 %v276_v25, %v352_v29  ;;  %v277_v28 = vld [vmem:[#allocation7] sm:$0xff] }
 0x184   : > { %289 = vrot.lane.b32.xlu1 %v275_v24, %s3439_s7  ;;  %v448_v36 = vand.u32 4294901760, %v3662_v31  ;;  %v455_v37 = vand.u32 4294901760, %v3664_v32  ;;  %v3061_v38 = vpack.c.bf16 %v3664_v32, %v3662_v31 }
 0x185   : > { %v462_v39 = vand.u32 4294901760, %v3668_v34  ;;  %v469_v40 = vand.u32 4294901760, %v3670_v35  ;;  %v3064_v41 = vpack.c.bf16 %v3670_v35, %v3668_v34 }
 0x186   : > { %v449_v42 = vsub.f32 %v3662_v31, %v448_v36  ;;  %v456_v43 = vsub.f32 %v3664_v32, %v455_v37  ;;  %v3683_v44 = vpack.c.bf16 %v455_v37, %v448_v36 }
 0x187   : > { %v463_v45 = vsub.f32 %v3668_v34, %v462_v39  ;;  %v470_v46 = vsub.f32 %v3670_v35, %v469_v40  ;;  %v3687_v47 = vpack.c.bf16 %v469_v40, %v462_v39  ;;  %v921_v35 = vstv %s919_s23  ;;  %s3362_s23 = scalar_lea.vmem %s3361_s22, 256 }
 0x188   : > { %291 = vrot.lane.b32.xlu1 %v276_v25, %s3439_s7  ;;  %v450_v48 = vand.u32 4294901760, %v449_v42  ;;  %v457_v49 = vand.u32 4294901760, %v456_v43  ;;  %v328_v42 = vsel %vm326_vm5, %v277_v28, 0  ;;  %p3364_p9 = scmp.lt.s32.totalorder %s3362_s23, %s3356_s14 }
 0x189   : > { %v464_v50 = vand.u32 4294901760, %v463_v45  ;;  %v471_v51 = vand.u32 4294901760, %v470_v46 }
 0x18a   : > { %v3690_v52 = vpack.c.bf16 %v457_v49, %v450_v48  ;;  %p3365_p11 = por %p3364_p9, %p3363_p6 }
 0x18b   : > { %v3692_v53 = vpack.c.bf16 %v471_v51, %v464_v50  ;;  %v3764_v51 = vand.u32 4294901760, %v328_v42 }
 0x18c   : > { %303 = vrot.lane.b32.xlu1 %v273_v22, %s3440_s6  ;;  %v3443_v22 = vmov 0   ;;  %p3366_p0 = pnand %p3365_p11, %p3359_p4 }
 0x18d   : > { %3277 = vset.pattern.permute.xlu0 %v3443_v22 }
 0x18e   : > { %323 = vperm.xlu0 %3277, %v3740_v16  }
 0x190   : > { %305 = vrot.lane.b32.xlu1 %v274_v23, %s3440_s6 }
 0x194   : > { %307 = vrot.lane.b32.xlu1 %v275_v24, %s3440_s6 }
 0x198   : > { %309 = vrot.lane.b32.xlu1 %v276_v25, %s3440_s6 }
 0x1f2   : > { %v288_v59 = vpop.permute.xlu1 %287  ;;  %v286_v60 = vpop.permute.xlu0 %285 }
 0x1f3   : > { %v300_v61 = vsel %vm3705_vm3, %v288_v59, 0.0  ;;  %v299_v62 = vsel %vm3705_vm3, %v286_v60, 0.0 }
 0x1f4   : > { %v334_v63 = vand.u32 4294901760, %v300_v61  ;;  %v331_v0 = vand.u32 4294901760, %v299_v62 }
 0x1f6   : > { %v3713_v1 = vsub.f32 %v300_v61, %v334_v63  ;;  %v3715_v2 = vpack.c.bf16 %v334_v63, %v331_v0  ;;  %v3717_v3 = vsub.f32 %v299_v62, %v331_v0  ;;  %v290_v4 = vpop.permute.xlu1 %289  ;;  %v3771_v61 = vsub.f32 %v328_v42, %v3764_v51 }
 0x1f7   : > { %v301_v5 = vsel %vm3705_vm3, %v290_v4, 0.0 }
 0x1f8   : > { %v337_v7 = vand.u32 4294901760, %v301_v5  ;;  %3020 = vmatpush3.bf16.msra.mxu1 %v3715_v2  ;;  %v420_v8 = vand.u32 4294901760, %v3717_v3  ;;  %v427_v9 = vand.u32 4294901760, %v3713_v1  ;;  %v409_v4 = vand.u32 4294901760, %v3771_v61 }
 0x1f9   : > { %3021 = vmatprep.subr.bf16.mxu1 %v3438_v20 }
 0x1fa   : > { %v3728_v10 = vsub.f32 %v301_v5, %v337_v7  ;;  %v292_v11 = vpop.permute.xlu1 %291  ;;  %v421_v12 = vsub.f32 %v3717_v3, %v420_v8  ;;  %v428_v13 = vsub.f32 %v3713_v1, %v427_v9  ;;  %v3732_v14 = vpack.c.bf16 %v427_v9, %v420_v8 }
 0x1fb   : > { %v302_v15 = vsel %vm3705_vm3, %v292_v11, 0.0 }
 0x1fc   : > { %v434_v17 = vand.u32 4294901760, %v3728_v10  ;;  %v340_v18 = vand.u32 4294901760, %v302_v15  ;;  %v422_v19 = vand.u32 4294901760, %v421_v12  ;;  %v429_v21 = vand.u32 4294901760, %v428_v13 }
 0x1fd   : > { %v410_v13 = vsub.f32 %v3771_v61, %v409_v4 }
 0x1fe   : > { %v3744_v23 = vpack.c.bf16 %v340_v18, %v337_v7  ;;  %v3746_v24 = vsub.f32 %v302_v15, %v340_v18  ;;  %v304_v25 = vpop.permute.xlu1 %303  ;;  %v3037_v26 = vpack.c.bf16 %v429_v21, %v422_v19  ;;  %v435_v29 = vsub.f32 %v3728_v10, %v434_v17 }
 0x1ff   : > { %v317_v27 = vsel %vm313_vm4, %v304_v25, 0.0  ;;  %v411_v25 = vand.u32 4294901760, %v410_v13 }
 0x200   : > { %v441_v36 = vand.u32 4294901760, %v3746_v24  ;;  %v355_v37 = vand.u32 4294901760, %v317_v27  ;;  %3023 = vmatpush3.bf16.msra.mxu1 %v3744_v23  ;;  %3038 = vmatpush3.bf16.msra.mxu0 %v3037_v26  ;;  %v436_v49 = vand.u32 4294901760, %v435_v29  ;;  %v3058_v42 = vpack.c.bf16 %v3746_v24, %v3728_v10  ;;  %v279_v10 = vld [vmem:[#allocation7 + $0x8] sm:$0xff] }
 0x201   : > { %3024 = vmatprep.subr.bf16.mxu1 %v3438_v20  ;;  %3039 = vmatprep.subr.bf16.mxu0 %v3438_v20 }
 0x202   : > { %v442_v39 = vsub.f32 %v3746_v24, %v441_v36  ;;  %v306_v40 = vpop.permute.xlu1 %305  ;;  %v3756_v43 = vpack.c.bf16 %v441_v36, %v434_v17  ;;  %v3760_v46 = vsub.f32 %v317_v27, %v355_v37 }
 0x203   : > { %v318_v45 = vsel %vm313_vm4, %v306_v40, 0.0 }
 0x204   : > { %v358_v48 = vand.u32 4294901760, %v318_v45  ;;  %3026 = vmatpush3.bf16.msra.mxu1 %v3660_v30  ;;  %v443_v50 = vand.u32 4294901760, %v442_v39  ;;  %v476_v62 = vand.u32 4294901760, %v3760_v46 }
 0x205   : > { %3027 = vmatprep.subr.bf16.mxu1 %v3438_v20 }
 0x206   : > { %v3766_v55 = vsub.f32 %v318_v45, %v358_v48  ;;  %v308_v57 = vpop.permute.xlu1 %307  ;;  %v3040_v59 = vpack.c.bf16 %v443_v50, %v436_v49  ;;  %v3779_v5 = vpack.c.bf16 %v358_v48, %v355_v37  ;;  %v477_v15 = vsub.f32 %v3760_v46, %v476_v62 }
 0x207   : > { %v319_v60 = vsel %vm313_vm4, %v308_v57, 0.0 }
 0x208   : > { %v483_v63 = vand.u32 4294901760, %v3766_v55  ;;  %v361_v0 = vand.u32 4294901760, %v319_v60  ;;  %3029 = vmatpush3.bf16.msra.mxu1 %v3666_v33  ;;  %3041 = vmatpush3.bf16.msra.mxu0 %v3040_v59  ;;  %v478_v28 = vand.u32 4294901760, %v477_v15 }
 0x209   : > { %3030 = vmatprep.subr.bf16.mxu1 %v3438_v20  ;;  %3042 = vmatprep.subr.bf16.mxu0 %v3438_v20 }
 0x20a   : > { %v484_v7 = vsub.f32 %v3766_v55, %v483_v63  ;;  %v489_v8 = vsub.f32 %v319_v60, %v361_v0  ;;  %v310_v9 = vpop.permute.xlu1 %309  ;;  %v3782_v11 = vpack.c.bf16 %v483_v63, %v476_v62 }
 0x20b   : > { %v320_v12 = vsel %vm313_vm4, %v310_v9, 0.0 }
 0x20c   : > { %v490_v17 = vand.u32 4294901760, %v489_v8  ;;  %v364_v18 = vand.u32 4294901760, %v320_v12  ;;  %3032 = vmatpush3.bf16.msra.mxu1 %v3779_v5  ;;  %3044 = vmatpush3.bf16.msra.mxu0 %v3690_v52  ;;  %v485_v22 = vand.u32 4294901760, %v484_v7 }
 0x20d   : > { %3033 = vmatprep.subr.bf16.mxu1 %v3438_v20  ;;  %3045 = vmatprep.subr.bf16.mxu0 %v3438_v20  ;;  %v324_v32 = vpop.permute.xlu0 %323 }
 0x20e   : > { %v3794_v19 = vpack.c.bf16 %v364_v18, %v361_v0  ;;  %v496_v21 = vsub.f32 %v320_v12, %v364_v18  ;;  %v491_v26 = vsub.f32 %v489_v8, %v490_v17  ;;  %v3049_v29 = vpack.c.bf16 %v485_v22, %v478_v28 }
 0x210   : > { %v497_v27 = vand.u32 4294901760, %v496_v21  ;;  %3035 = vmatpush3.bf16.msra.mxu1 %v3794_v19  ;;  %3047 = vmatpush3.bf16.msra.mxu0 %v3692_v53  ;;  %v492_v37 = vand.u32 4294901760, %v491_v26  ;;  %v3055_v53 = vpack.c.bf16 %v3713_v1, %v3717_v3  ;;  %v3067_v1 = vpack.c.bf16 %v3766_v55, %v3760_v46 }
 0x211   : > { %3048 = vmatprep.subr.bf16.mxu0 %v3438_v20  ;;  %3129 = vmatprep.subr.bf16.mxu1 %v3438_v20  ;;  %v3070_v3 = vpack.c.bf16 %v496_v21, %v489_v8 }
 0x212   : > { %v498_v52 = vsub.f32 %v496_v21, %v497_v27  ;;  %v3106_v36 = vpack.c.bf16 %v497_v27, %v490_v17 }
 0x213   : > { %2719 = vmatmul.mubr.f32.vlgmr.msra.gmra.mrb[0].mxu1 %v411_v25 }
 0x214   : > { %3050 = vmatpush3.bf16.msra.mxu0 %v3049_v29  ;;  %v499_v39 = vand.u32 4294901760, %v498_v52  ;;  %2871 = vmatprep.mubr.msk.f32.mxu1 %vm3441_vm0, %v3442_v54 }
 0x215   : > { %3051 = vmatprep.subr.bf16.mxu0 %v3438_v20 }
 0x216   : > { %v3052_v40 = vpack.c.bf16 %v499_v39, %v492_v37 }
 0x218   : > { %3053 = vmatpush3.bf16.msra.mxu0 %v3052_v40 }
 0x219   : > { %3054 = vmatprep.subr.bf16.mxu0 %v3438_v20 }
 0x21b   : > { %2746 = vmatmul.mubr.f32.vlgmr.msra.gmra.mrb[0].mxu0 %v3764_v51 }
 0x21c   : > { %3056 = vmatpush3.bf16.msra.mxu0 %v3055_v53  ;;  %2772 = vmatprep.mubr.msk.f32.mxu0 %vm3441_vm0, %v3442_v54 }
 0x21d   : > { %3057 = vmatprep.subr.bf16.mxu0 %v3438_v20 }
 0x220   : > { %3059 = vmatpush3.bf16.msra.mxu0 %v3058_v42 }
 0x221   : > { %3060 = vmatprep.subr.bf16.mxu0 %v3438_v20 }
 0x224   : > { %3062 = vmatpush3.bf16.msra.mxu0 %v3061_v38 }
 0x225   : > { %3063 = vmatprep.subr.bf16.mxu0 %v3438_v20 }
 0x228   : > { %3065 = vmatpush3.bf16.msra.mxu0 %v3064_v41 }
 0x229   : > { %3066 = vmatprep.subr.bf16.mxu0 %v3438_v20 }
 0x22c   : > { %3068 = vmatpush3.bf16.msra.mxu0 %v3067_v1 }
 0x22d   : > { %3069 = vmatprep.subr.bf16.mxu0 %v3438_v20 }
 0x230   : > { %3071 = vmatpush3.bf16.msra.mxu0 %v3070_v3 }
 0x231   : > { %3072 = vmatprep.subr.bf16.mxu0 %v3438_v20 }
 0x233   : > { %2773 = vmatmul.mubr.f32.vlgmr.msra.gmra.mrb[0].mxu0 %v3771_v61 }
 0x234   : > { %3074 = vmatpush3.bf16.msra.mxu0 %v3715_v2  ;;  %2799 = vmatprep.mubr.msk.f32.mxu0 %vm3441_vm0, %v3442_v54 }
 0x235   : > { %3075 = vmatprep.subr.bf16.mxu0 %v3438_v20 }
 0x238   : > { %3077 = vmatpush3.bf16.msra.mxu0 %v3744_v23 }
 0x239   : > { %3078 = vmatprep.subr.bf16.mxu0 %v3438_v20 }
 0x23c   : > { %3080 = vmatpush3.bf16.msra.mxu0 %v3660_v30 }
 0x23d   : > { %3081 = vmatprep.subr.bf16.mxu0 %v3438_v20 }
 0x240   : > { %3083 = vmatpush3.bf16.msra.mxu0 %v3666_v33 }
 0x241   : > { %3084 = vmatprep.subr.bf16.mxu0 %v3438_v20 }
 0x244   : > { %3086 = vmatpush3.bf16.msra.mxu0 %v3779_v5 }
 0x245   : > { %3087 = vmatprep.subr.bf16.mxu0 %v3438_v20 }
 0x248   : > { %3089 = vmatpush3.bf16.msra.mxu0 %v3794_v19 }
 0x249   : > { %3090 = vmatprep.subr.bf16.mxu0 %v3438_v20 }
 0x24b   : > { %2800 = vmatmul.mubr.f32.vlgmr.msra.gmra.mrb[0].mxu0 %v409_v4 }
 0x24c   : > { %3092 = vmatpush3.bf16.msra.mxu0 %v3732_v14  ;;  %2826 = vmatprep.mubr.msk.f32.mxu0 %vm3441_vm0, %v3442_v54  ;;  %v936_v14 = vsel %vm934_vm7, %v279_v10, 0 }
 0x24d   : > { %3093 = vmatprep.subr.bf16.mxu0 %v3438_v20 }
 0x250   : > { %3095 = vmatpush3.bf16.msra.mxu0 %v3756_v43 }
 0x251   : > { %3096 = vmatprep.subr.bf16.mxu0 %v3438_v20 }
 0x254   : > { %3098 = vmatpush3.bf16.msra.mxu0 %v3683_v44 }
 0x255   : > { %3099 = vmatprep.subr.bf16.mxu0 %v3438_v20 }
 0x258   : > { %3101 = vmatpush3.bf16.msra.mxu0 %v3687_v47 }
 0x259   : > { %3102 = vmatprep.subr.bf16.mxu0 %v3438_v20 }
 0x25c   : > { %3104 = vmatpush3.bf16.msra.mxu0 %v3782_v11 }
 0x25d   : > { %3105 = vmatprep.subr.bf16.mxu0 %v3438_v20 }
 0x260   : > { %3107 = vmatpush3.bf16.msra.mxu0 %v3106_v36 }
 0x261   : > { %3108 = vmatprep.subr.bf16.mxu0 %v3438_v20 }
 0x263   : > { %2827 = vmatmul.mubr.f32.vlgmr.msra.gmra.mrb[0].mxu0 %v3764_v51 }
 0x264   : > { %3110 = vmatpush3.bf16.msra.mxu0 %v3715_v2  ;;  %2853 = vmatprep.mubr.msk.f32.mxu0 %vm3441_vm0, %v3442_v54  ;;  %v3444_v2 = vmov 1  }
 0x265   : > { %3111 = vmatprep.subr.bf16.mxu0 %v3438_v20  ;;  %3278 = vset.pattern.permute.xlu0 %v3444_v2 }
 0x266   : > { %931 = vperm.xlu0 %3278, %v3740_v16  }
 0x268   : > { %3113 = vmatpush3.bf16.msra.mxu0 %v3744_v23  ;;  %v1006_v23 = vand.u32 4294901760, %v936_v14 }
 0x269   : > { %3114 = vmatprep.subr.bf16.mxu0 %v3438_v20 }
 0x26a   : > { %v1007_v43 = vsub.f32 %v936_v14, %v1006_v23  ;;  %v1427_v14 = vadd.s32 2, %v3702_v56 }
 0x26c   : > { %3116 = vmatpush3.bf16.msra.mxu0 %v3660_v30  ;;  %v1008_v46 = vand.u32 4294901760, %v1007_v43  ;;  %vm1429_vm12 = vcmp.lt.s32.totalorder %v1427_v14, 32 }
 0x26d   : > { %3117 = vmatprep.subr.bf16.mxu0 %v3438_v20 }
 0x26e   : > { %v1009_v55 = vsub.f32 %v1007_v43, %v1008_v46 }
 0x270   : > { %3119 = vmatpush3.bf16.msra.mxu0 %v3666_v33  ;;  %v1010_v4 = vand.u32 4294901760, %v1009_v55 }
 0x271   : > { %3120 = vmatprep.subr.bf16.mxu0 %v3438_v20 }
 0x274   : > { %3122 = vmatpush3.bf16.msra.mxu0 %v3779_v5 }
 0x275   : > { %3123 = vmatprep.subr.bf16.mxu0 %v3438_v20 }
 0x278   : > { %3125 = vmatpush3.bf16.msra.mxu0 %v3794_v19 }
 0x279   : > { %3126 = vmatprep.subr.bf16.mxu0 %v3438_v20 }
 0x27b   : > { %2854 = vmatmul.mubr.f32.vlgmr.msra.gmra.mrb[0].mxu0 %v3764_v51 }
 0x27c   : > { %2862 = vmatprep.mubr.msk.f32.mxu0 %vm3441_vm0, %v3442_v54 }
 0x2e5   : > { %v932_v19 = vpop.permute.xlu0 %931 }
 0x2e6   : > { %v413_v30 = vpop.f32.mrb[0].mxu1 }
 0x2e7   : > { %v2720_v31 = vpop.f32.mrb[1].mxu1  ;;  %v414_v33 = vadd.f32 %v413_v30, %v324_v32  ;;  %v1413_v30 = vstv %s2537_s13 }
 0x34e   : > { %v915_v34 = vpop.f32.mrb[0].mxu0 }
 0x34f   : > { %v3873_v38 = vadd.f32 %v915_v34, %v414_v33  ;;  %v2855_v41 = vpop.f32.mrb[1].mxu0  ;;  %v3447_v34 = vmov 2  }
 0x350   : > { %3279 = vset.pattern.permute.xlu0 %v3447_v34 }
 0x351   : > { %vm920_vm6 = vcmp.ge.f32.partialorder %v3873_v38, 0.0  ;;  %v922_v44 = vmul.f32 %v3873_v38, %v921_v35  ;;  %1435 = vperm.xlu0 %3279, %v3740_v16   ;;  %v281_v35 = vld [vmem:[#allocation7 + $0x10] sm:$0xff] }
 0x352   : > { %v1439_v41 = vsel %vm934_vm7, %v281_v35, 0 }
 0x353   : > { %v923_v47 = vsel %vm920_vm6, %v3873_v38, %v922_v44  ;;  %v3916_v44 = vand.u32 4294901760, %v1439_v41 }
 0x354   : > { %924 = vrot.lane.b32.xlu1 %v923_v47, %s3439_s7  ;;  %v942_v24 = vand.u32 4294901760, %v923_v47  ;;  %s3990_s7 = scalar_lea.hbm %s4038_s4, %s2540_s26 }
 0x355   : > { %v1510_v2 = vsub.f32 %v1439_v41, %v3916_v44 }
 0x356   : > { %v1025_v45 = vsub.f32 %v923_v47, %v942_v24 }
 0x358   : > { %927 = vrot.lane.b32.xlu1 %v923_v47, %s3440_s6  ;;  %v1026_v51 = vand.u32 4294901760, %v1025_v45  ;;  %s2419_s6 = scalar_lea.sflag [#allocation4], %s3644_s0 }
 0x35a   : > { %v1027_v0 = vsub.f32 %v1025_v45, %v1026_v51 }
 0x35c   : > { %v1028_v9 = vand.u32 4294901760, %v1027_v0 }
 0x3c6   : > { %v925_v48 = vpop.permute.xlu1 %924 }
 0x3c7   : > { %v926_v49 = vsel %vm3705_vm3, %v925_v48, 0.0 }
 0x3c8   : > { %v939_v50 = vand.u32 4294901760, %v926_v49 }
 0x3ca   : > { %v3127_v57 = vpack.c.bf16 %v942_v24, %v939_v50  ;;  %v1018_v59 = vsub.f32 %v926_v49, %v939_v50  ;;  %v928_v60 = vpop.permute.xlu1 %927 }
 0x3cb   : > { %v929_v61 = vsel %vm313_vm4, %v928_v60, 0.0 }
 0x3cc   : > { %v1019_v62 = vand.u32 4294901760, %v1018_v59  ;;  %v945_v63 = vand.u32 4294901760, %v929_v61  ;;  %3128 = vmatpush3.bf16.msra.mxu0 %v3127_v57  ;;  %v3133_v13 = vpack.c.bf16 %v1025_v45, %v1018_v59 }
 0x3cd   : > { %2860 = vmatprep.subr.mxu0 %v3442_v54 }
 0x3ce   : > { %v1020_v5 = vsub.f32 %v1018_v59, %v1019_v62  ;;  %v1032_v7 = vsub.f32 %v929_v61, %v945_v63  ;;  %v3139_v15 = vpack.c.bf16 %v1026_v51, %v1019_v62 }
 0x3d0   : > { %v1021_v58 = vand.u32 4294901760, %v1020_v5  ;;  %v1033_v8 = vand.u32 4294901760, %v1032_v7  ;;  %2861 = vmatpush3.msra.mxu0 %v945_v63 }
 0x3d1   : > { %2863 = vmatmul.mubr.f32.vlgmr.msra.gmra.mrb[2].mxu0 %v1010_v4 }
 0x3d2   : > { %v1034_v11 = vsub.f32 %v1032_v7, %v1033_v8  ;;  %v3130_v12 = vpack.c.bf16 %v1028_v9, %v1021_v58 }
 0x3d4   : > { %3131 = vmatpush3.bf16.msra.mxu1 %v3130_v12  ;;  %v1035_v6 = vand.u32 4294901760, %v1034_v11 }
 0x3d5   : > { %2869 = vmatprep.subr.mxu1 %v3442_v54 }
 0x3d8   : > { %2870 = vmatpush3.msra.mxu1 %v1035_v6 }
 0x3d9   : > { %2872 = vmatmul.mubr.f32.vlgmr.msra.gmra.mrb[2].mxu1 %v1006_v23  ;;  %3132 = vmatprep.subr.bf16.mxu1 %v3438_v20 }
 0x3da   : > { %3134 = vmatpush3.bf16.msra.mxu1 %v3133_v13  ;;  %2880 = vmatprep.mubr.msk.f32.mxu1 %vm3441_vm0, %v3442_v54  ;;  %v1436_v13 = vpop.permute.xlu0 %1435 }
 0x3db   : > { %2878 = vmatprep.subr.mxu1 %v3442_v54 }
 0x3de   : > { %2879 = vmatpush3.msra.mxu1 %v1032_v7 }
 0x3df   : > { %2881 = vmatmul.mubr.f32.vlgmr.msra.gmra.mrb[4].mxu1 %v1007_v43  ;;  %3135 = vmatprep.subr.bf16.mxu1 %v3438_v20 }
 0x3e0   : > { %3137 = vmatpush3.bf16.msra.mxu1 %v3127_v57  ;;  %2889 = vmatprep.mubr.msk.f32.mxu1 %vm3441_vm0, %v3442_v54 }
 0x3e1   : > { %2887 = vmatprep.subr.mxu1 %v3442_v54 }
 0x3e4   : > { %2888 = vmatpush3.msra.mxu1 %v945_v63 }
 0x3e5   : > { %2890 = vmatmul.mubr.f32.vlgmr.msra.gmra.mrb[6].mxu1 %v1008_v46  ;;  %3138 = vmatprep.subr.bf16.mxu1 %v3438_v20 }
 0x3e6   : > { %3140 = vmatpush3.bf16.msra.mxu1 %v3139_v15  ;;  %2898 = vmatprep.mubr.msk.f32.mxu1 %vm3441_vm0, %v3442_v54 }
 0x3e7   : > { %2896 = vmatprep.subr.mxu1 %v3442_v54 }
 0x3ea   : > { %2897 = vmatpush3.msra.mxu1 %v1033_v8 }
 0x3eb   : > { %2899 = vmatmul.mubr.f32.vlgmr.msra.gmra.mrb[8].mxu1 %v1006_v23  ;;  %3141 = vmatprep.subr.bf16.mxu1 %v3438_v20 }
 0x3ec   : > { %3143 = vmatpush3.bf16.msra.mxu1 %v3127_v57  ;;  %2907 = vmatprep.mubr.msk.f32.mxu1 %vm3441_vm0, %v3442_v54 }
 0x3ed   : > { %2905 = vmatprep.subr.mxu1 %v3442_v54 }
 0x3f0   : > { %2906 = vmatpush3.msra.mxu1 %v945_v63 }
 0x3f1   : > { %2908 = vmatmul.mubr.f32.vlgmr.msra.gmra.mrb[10].mxu1 %v1006_v23  ;;  %3144 = vmatprep.subr.bf16.mxu1 %v3438_v20  ;;  %v1511_v23 = vand.u32 4294901760, %v1510_v2 }
 0x3f2   : > { %2916 = vmatprep.mubr.msk.f32.mxu1 %vm3441_vm0, %v3442_v54 }
 0x3f3   : > { %v1512_v48 = vsub.f32 %v1510_v2, %v1511_v23 }
 0x3f5   : > { %v1513_v61 = vand.u32 4294901760, %v1512_v48 }
 0x4a4   : > { %v1012_v17 = vpop.f32.mrb[2].mxu0 }
 0x4a5   : > { %v2864_v18 = vpop.f32.mrb[3].mxu0  ;;  %v1013_v21 = vadd.f32 %v1012_v17, %v932_v19 }
 0x4ac   : > { %v1098_v22 = vpop.f32.mrb[2].mxu1 }
 0x4ad   : > { %v1099_v25 = vadd.f32 %v1098_v22, %v1013_v21  ;;  %v2873_v26 = vpop.f32.mrb[3].mxu1 }
 0x4b2   : > { %v1176_v27 = vpop.f32.mrb[4].mxu1 }
 0x4b3   : > { %v1177_v28 = vadd.f32 %v1176_v27, %v1099_v25  ;;  %v2882_v52 = vpop.f32.mrb[5].mxu1 }
 0x4b8   : > { %v1252_v29 = vpop.f32.mrb[6].mxu1 }
 0x4b9   : > { %v1253_v36 = vadd.f32 %v1252_v29, %v1177_v28  ;;  %v2891_v37 = vpop.f32.mrb[7].mxu1 }
 0x4be   : > { %v1332_v39 = vpop.f32.mrb[8].mxu1 }
 0x4bf   : > { %v1333_v40 = vadd.f32 %v1332_v39, %v1253_v36  ;;  %v2900_v53 = vpop.f32.mrb[9].mxu1 }
 0x4c0   : > { %v1916_v53 = vstv %s2538_s5 }
 0x4c4   : > { %v1406_v42 = vpop.f32.mrb[10].mxu1 }
 0x4c5   : > { %v1407_v1 = vadd.f32 %v1406_v42, %v1333_v40  ;;  %v2909_v3 = vpop.f32.mrb[11].mxu1 }
 0x4c7   : > { %v3908_v31 = vadd.f32 %v3873_v38, %v1407_v1  ;;  %v1418_v38 = vadd.s32 4294967294, %v3702_v56 }
 0x4c9   : > { %vm1412_vm8 = vcmp.ge.f32.partialorder %v3908_v31, 0.0  ;;  %v1414_v32 = vmul.f32 %v1413_v30, %v3908_v31  ;;  %vm1419_vm9 = vcmp.ge.s32.totalorder %v1418_v38, 0  ;;  %vm1420_vm10 = vcmp.lt.s32.totalorder %v1418_v38, 32 }
 0x4ca   : > { %vm1421_vm11 = vmand %vm1419_vm9, %vm1420_vm10  ;;  %v3450_v30 = vmov 3  }
 0x4cb   : > { %v1415_v33 = vsel %vm1412_vm8, %v3908_v31, %v1414_v32  ;;  %3280 = vset.pattern.permute.xlu0 %v3450_v30  ;;  %v283_v32 = vld [vmem:[#allocation7 + $0x18] sm:$0xff] }
 0x4cc   : > { %1416 = vrot.lane.b32.xlu1 %v1415_v33, %s3445_s20  ;;  %v1445_v47 = vand.u32 4294901760, %v1415_v33  ;;  %1938 = vperm.xlu0 %3280, %v3740_v16  }
 0x4ce   : > { %v1528_v10 = vsub.f32 %v1415_v33, %v1445_v47 }
 0x4d0   : > { %1425 = vrot.lane.b32.xlu1 %v1415_v33, %s3446_s25  ;;  %v1529_v46 = vand.u32 4294901760, %v1528_v10  ;;  %v1942_v33 = vsel %vm934_vm7, %v283_v32, 0 }
 0x4d1   : > { %v3956_v34 = vand.u32 4294901760, %v1942_v33 }
 0x4d2   : > { %v1530_v60 = vsub.f32 %v1528_v10, %v1529_v46 }
 0x4d3   : > { %v2013_v41 = vsub.f32 %v1942_v33, %v3956_v34 }
 0x4d4   : > { %v1531_v5 = vand.u32 4294901760, %v1530_v60 }
 0x53e   : > { %v1417_v24 = vpop.permute.xlu1 %1416 }
 0x53f   : > { %v1424_v43 = vsel %vm1421_vm11, %v1417_v24, 0.0 }
 0x540   : > { %v1442_v45 = vand.u32 4294901760, %v1424_v43 }
 0x542   : > { %v3145_v49 = vpack.c.bf16 %v1445_v47, %v1442_v45  ;;  %v1521_v50 = vsub.f32 %v1424_v43, %v1442_v45  ;;  %v1426_v51 = vpop.permute.xlu1 %1425  ;;  %v2014_v47 = vand.u32 4294901760, %v2013_v41 }
 0x543   : > { %v1433_v55 = vsel %vm1429_vm12, %v1426_v51, 0.0 }
 0x544   : > { %v1522_v57 = vand.u32 4294901760, %v1521_v50  ;;  %v1448_v59 = vand.u32 4294901760, %v1433_v55  ;;  %3146 = vmatpush3.bf16.msra.mxu1 %v3145_v49  ;;  %v3151_v9 = vpack.c.bf16 %v1528_v10, %v1521_v50 }
 0x545   : > { %2914 = vmatprep.subr.mxu1 %v3442_v54 }
 0x546   : > { %v1523_v62 = vsub.f32 %v1521_v50, %v1522_v57  ;;  %v1535_v63 = vsub.f32 %v1433_v55, %v1448_v59  ;;  %v3157_v11 = vpack.c.bf16 %v1529_v46, %v1522_v57 }
 0x548   : > { %v1524_v0 = vand.u32 4294901760, %v1523_v62  ;;  %v1536_v4 = vand.u32 4294901760, %v1535_v63  ;;  %2915 = vmatpush3.msra.mxu1 %v1448_v59 }
 0x549   : > { %2917 = vmatmul.mubr.f32.vlgmr.msra.gmra.mrb[12].mxu1 %v1513_v61  ;;  %3147 = vmatprep.subr.bf16.mxu1 %v3438_v20 }
 0x54a   : > { %v1537_v7 = vsub.f32 %v1535_v63, %v1536_v4  ;;  %v3148_v58 = vpack.c.bf16 %v1531_v5, %v1524_v0  ;;  %2925 = vmatprep.mubr.msk.f32.mxu1 %vm3441_vm0, %v3442_v54 }
 0x54c   : > { %3149 = vmatpush3.bf16.msra.mxu1 %v3148_v58  ;;  %v1538_v8 = vand.u32 4294901760, %v1537_v7  ;;  %v1939_v58 = vpop.permute.xlu0 %1938 }
 0x54d   : > { %2923 = vmatprep.subr.mxu1 %v3442_v54 }
 0x550   : > { %2924 = vmatpush3.msra.mxu1 %v1538_v8 }
 0x551   : > { %2926 = vmatmul.mubr.f32.vlgmr.msra.gmra.mrb[14].mxu1 %v3916_v44  ;;  %3150 = vmatprep.subr.bf16.mxu1 %v3438_v20 }
 0x552   : > { %3152 = vmatpush3.bf16.msra.mxu1 %v3151_v9  ;;  %2934 = vmatprep.mubr.msk.f32.mxu1 %vm3441_vm0, %v3442_v54 }
 0x553   : > { %2932 = vmatprep.subr.mxu1 %v3442_v54 }
 0x556   : > { %2933 = vmatpush3.msra.mxu1 %v1535_v63 }
 0x557   : > { %2935 = vmatmul.mubr.f32.vlgmr.msra.gmra.mrb[16].mxu1 %v1510_v2  ;;  %3153 = vmatprep.subr.bf16.mxu1 %v3438_v20 }
 0x558   : > { %3155 = vmatpush3.bf16.msra.mxu1 %v3145_v49  ;;  %2943 = vmatprep.mubr.msk.f32.mxu1 %vm3441_vm0, %v3442_v54 }
 0x559   : > { %2941 = vmatprep.subr.mxu1 %v3442_v54 }
 0x55c   : > { %2942 = vmatpush3.msra.mxu1 %v1448_v59 }
 0x55d   : > { %2944 = vmatmul.mubr.f32.vlgmr.msra.gmra.mrb[18].mxu1 %v1511_v23  ;;  %3156 = vmatprep.subr.bf16.mxu1 %v3438_v20  ;;  %v2015_v23 = vsub.f32 %v2013_v41, %v2014_v47 }
 0x55e   : > { %3158 = vmatpush3.bf16.msra.mxu1 %v3157_v11  ;;  %2952 = vmatprep.mubr.msk.f32.mxu1 %vm3441_vm0, %v3442_v54 }
 0x55f   : > { %2950 = vmatprep.subr.mxu1 %v3442_v54  ;;  %v2016_v51 = vand.u32 4294901760, %v2015_v23 }
 0x562   : > { %2951 = vmatpush3.msra.mxu1 %v1536_v4 }
 0x563   : > { %2953 = vmatmul.mubr.f32.vlgmr.msra.gmra.mrb[20].mxu1 %v3916_v44  ;;  %3159 = vmatprep.subr.bf16.mxu1 %v3438_v20 }
 0x564   : > { %3161 = vmatpush3.bf16.msra.mxu1 %v3145_v49  ;;  %2961 = vmatprep.mubr.msk.f32.mxu1 %vm3441_vm0, %v3442_v54 }
 0x565   : > { %2959 = vmatprep.subr.mxu1 %v3442_v54 }
 0x568   : > { %2960 = vmatpush3.msra.mxu1 %v1448_v59 }
 0x569   : > { %2962 = vmatmul.mubr.f32.vlgmr.msra.gmra.mrb[22].mxu1 %v3916_v44  ;;  %3162 = vmatprep.subr.bf16.mxu1 %v3438_v20  ;;  %v1930_v44 = vadd.s32 4, %v3702_v56 }
 0x56a   : > { %2970 = vmatprep.mubr.msk.f32.mxu1 %vm3441_vm0, %v3442_v54 }
 0x56b   : > { %vm1932_vm2 = vcmp.lt.s32.totalorder %v1930_v44, 32 }
 0x61c   : > { %v1515_v12 = vpop.f32.mrb[12].mxu1 }
 0x61d   : > { %v2918_v6 = vpop.f32.mrb[13].mxu1  ;;  %v1516_v15 = vadd.f32 %v1515_v12, %v1436_v13 }
 0x624   : > { %v1601_v17 = vpop.f32.mrb[14].mxu1 }
 0x625   : > { %v1602_v18 = vadd.f32 %v1601_v17, %v1516_v15  ;;  %v2927_v19 = vpop.f32.mrb[15].mxu1 }
 0x62a   : > { %v1679_v21 = vpop.f32.mrb[16].mxu1 }
 0x62b   : > { %v1680_v22 = vadd.f32 %v1679_v21, %v1602_v18  ;;  %v2936_v25 = vpop.f32.mrb[17].mxu1 }
 0x630   : > { %v1755_v26 = vpop.f32.mrb[18].mxu1 }
 0x631   : > { %v1756_v27 = vadd.f32 %v1755_v26, %v1680_v22  ;;  %v2945_v28 = vpop.f32.mrb[19].mxu1 }
 0x636   : > { %v1835_v52 = vpop.f32.mrb[20].mxu1 }
 0x637   : > { %v1836_v29 = vadd.f32 %v1835_v52, %v1756_v27  ;;  %v2954_v36 = vpop.f32.mrb[21].mxu1 }
 0x63c   : > { %v1909_v37 = vpop.f32.mrb[22].mxu1 }
 0x63d   : > { %v1910_v39 = vadd.f32 %v1909_v37, %v1836_v29  ;;  %v2963_v40 = vpop.f32.mrb[23].mxu1 }
 0x63f   : > { %v3948_v42 = vadd.f32 %v1910_v39, %v3908_v31  ;;  %v1921_v31 = vadd.s32 4294967292, %v3702_v56 }
 0x641   : > { %vm1915_vm13 = vcmp.ge.f32.partialorder %v3948_v42, 0.0  ;;  %v1917_v1 = vmul.f32 %v1916_v53, %v3948_v42  ;;  %vm1922_vm14 = vcmp.ge.s32.totalorder %v1921_v31, 0  ;;  %vm1923_vm15 = vcmp.lt.s32.totalorder %v1921_v31, 32 }
 0x642   : > { %vm1924_vm1 = vmand %vm1922_vm14, %vm1923_vm15 }
 0x643   : > { %v1918_v3 = vsel %vm1915_vm13, %v3948_v42, %v1917_v1 }
 0x644   : > { %1919 = vrot.lane.b32.xlu1 %v1918_v3, %s3448_s8  ;;  %v1948_v35 = vand.u32 4294901760, %v1918_v3 }
 0x646   : > { %v2031_v38 = vsub.f32 %v1918_v3, %v1948_v35 }
 0x648   : > { %1928 = vrot.lane.b32.xlu1 %v1918_v3, %s3449_s10  ;;  %v2032_v14 = vand.u32 4294901760, %v2031_v38 }
 0x64a   : > { %v2033_v50 = vsub.f32 %v2031_v38, %v2032_v14 }
 0x64c   : > { %v2034_v60 = vand.u32 4294901760, %v2033_v50 }
 0x6b6   : > { %v1920_v2 = vpop.permute.xlu1 %1919 }
 0x6b7   : > { %v1927_v10 = vsel %vm1924_vm1, %v1920_v2, 0.0 }
 0x6b8   : > { %v1945_v16 = vand.u32 4294901760, %v1927_v10 }
 0x6ba   : > { %v3163_v24 = vpack.c.bf16 %v1948_v35, %v1945_v16  ;;  %v2024_v43 = vsub.f32 %v1927_v10, %v1945_v16  ;;  %v1929_v45 = vpop.permute.xlu1 %1928 }
 0x6bb   : > { %v1936_v46 = vsel %vm1932_vm2, %v1929_v45, 0.0 }
 0x6bc   : > { %v2025_v48 = vand.u32 4294901760, %v2024_v43  ;;  %v1951_v49 = vand.u32 4294901760, %v1936_v46  ;;  %3164 = vmatpush3.bf16.msra.mxu1 %v3163_v24  ;;  %v3169_v0 = vpack.c.bf16 %v2031_v38, %v2024_v43 }
 0x6bd   : > { %2968 = vmatprep.subr.mxu1 %v3442_v54 }
 0x6be   : > { %v2026_v55 = vsub.f32 %v2024_v43, %v2025_v48  ;;  %v2038_v56 = vsub.f32 %v1936_v46, %v1951_v49  ;;  %v3175_v4 = vpack.c.bf16 %v2032_v14, %v2025_v48 }
 0x6c0   : > { %v2027_v57 = vand.u32 4294901760, %v2026_v55  ;;  %v2039_v59 = vand.u32 4294901760, %v2038_v56  ;;  %2969 = vmatpush3.msra.mxu1 %v1951_v49 }
 0x6c1   : > { %2971 = vmatmul.mubr.f32.vlgmr.msra.gmra.mrb[24].mxu1 %v2016_v51  ;;  %3165 = vmatprep.subr.bf16.mxu1 %v3438_v20 }
 0x6c2   : > { %v2040_v61 = vsub.f32 %v2038_v56, %v2039_v59  ;;  %v3166_v62 = vpack.c.bf16 %v2034_v60, %v2027_v57  ;;  %2979 = vmatprep.mubr.msk.f32.mxu1 %vm3441_vm0, %v3442_v54 }
 0x6c4   : > { %3167 = vmatpush3.bf16.msra.mxu1 %v3166_v62  ;;  %v2041_v63 = vand.u32 4294901760, %v2040_v61 }
 0x6c5   : > { %2977 = vmatprep.subr.mxu1 %v3442_v54 }
 0x6c8   : > { %2978 = vmatpush3.msra.mxu1 %v2041_v63 }
 0x6c9   : > { %2980 = vmatmul.mubr.f32.vlgmr.msra.gmra.mrb[26].mxu1 %v3956_v34  ;;  %3168 = vmatprep.subr.bf16.mxu1 %v3438_v20 }
 0x6ca   : > { %3170 = vmatpush3.bf16.msra.mxu1 %v3169_v0  ;;  %2988 = vmatprep.mubr.msk.f32.mxu1 %vm3441_vm0, %v3442_v54 }
 0x6cb   : > { %2986 = vmatprep.subr.mxu1 %v3442_v54 }
 0x6ce   : > { %2987 = vmatpush3.msra.mxu1 %v2038_v56 }
 0x6cf   : > { %2989 = vmatmul.mubr.f32.vlgmr.msra.gmra.mrb[28].mxu1 %v2013_v41  ;;  %3171 = vmatprep.subr.bf16.mxu1 %v3438_v20 }
 0x6d0   : > { %3173 = vmatpush3.bf16.msra.mxu1 %v3163_v24  ;;  %2997 = vmatprep.mubr.msk.f32.mxu1 %vm3441_vm0, %v3442_v54 }
 0x6d1   : > { %2995 = vmatprep.subr.mxu1 %v3442_v54 }
 0x6d4   : > { %2996 = vmatpush3.msra.mxu1 %v1951_v49 }
 0x6d5   : > { %2998 = vmatmul.mubr.f32.vlgmr.msra.gmra.mrb[30].mxu1 %v2014_v47  ;;  %3174 = vmatprep.subr.bf16.mxu1 %v3438_v20 }
 0x6d6   : > { %3176 = vmatpush3.bf16.msra.mxu1 %v3175_v4  ;;  %3006 = vmatprep.mubr.msk.f32.mxu1 %vm3441_vm0, %v3442_v54 }
 0x6d7   : > { %3004 = vmatprep.subr.mxu1 %v3442_v54 }
 0x6da   : > { %3005 = vmatpush3.msra.mxu1 %v2039_v59 }
 0x6db   : > { %3007 = vmatmul.mubr.f32.vlgmr.msra.gmra.mrb[32].mxu1 %v3956_v34  ;;  %3177 = vmatprep.subr.bf16.mxu1 %v3438_v20 }
 0x6dc   : > { %3179 = vmatpush3.bf16.msra.mxu1 %v3163_v24  ;;  %3015 = vmatprep.mubr.msk.f32.mxu1 %vm3441_vm0, %v3442_v54 }
 0x6dd   : > { %3013 = vmatprep.subr.mxu1 %v3442_v54 }
 0x6e0   : > { %3014 = vmatpush3.msra.mxu1 %v1951_v49 }
 0x6e1   : > { %3016 = vmatmul.mubr.f32.vlgmr.msra.gmra.mrb[34].mxu1 %v3956_v34 }
 0x794   : > { %v2018_v5 = vpop.f32.mrb[24].mxu1 }
 0x795   : > { %v2972_v7 = vpop.f32.mrb[25].mxu1  ;;  %v2019_v8 = vadd.f32 %v2018_v5, %v1939_v58 }
 0x79c   : > { %v2104_v9 = vpop.f32.mrb[26].mxu1 }
 0x79d   : > { %v2105_v11 = vadd.f32 %v2104_v9, %v2019_v8  ;;  %v2981_v12 = vpop.f32.mrb[27].mxu1 }
 0x7a2   : > { %v2182_v6 = vpop.f32.mrb[28].mxu1 }
 0x7a3   : > { %v2183_v20 = vadd.f32 %v2182_v6, %v2105_v11  ;;  %v2990_v13 = vpop.f32.mrb[29].mxu1 }
 0x7a8   : > { %v2258_v15 = vpop.f32.mrb[30].mxu1 }
 0x7a9   : > { %v2259_v17 = vadd.f32 %v2258_v15, %v2183_v20  ;;  %v2999_v18 = vpop.f32.mrb[31].mxu1 }
 0x7ae   : > { %v2338_v54 = vpop.f32.mrb[32].mxu1 }
 0x7af   : > { %v2339_v19 = vadd.f32 %v2338_v54, %v2259_v17  ;;  %v3008_v21 = vpop.f32.mrb[33].mxu1 }
 0x7b4   : > { %v2412_v22 = vpop.f32.mrb[34].mxu1 }
 0x7b5   : > { %v2413_v25 = vadd.f32 %v2412_v22, %v2339_v19  ;;  %v3017_v26 = vpop.f32.mrb[35].mxu1 }
 0x7b7   : > { %v2416_v27 = vadd.f32 %v2413_v25, %v3948_v42 }
 0x7b9   : > { %2417 = vst [vmem:[%s244_s29] sm:$0xff] %v2416_v27 }
 0x7ba   : > { %3369 = shalt.err (!%p3366_p0)
}
 0x7bb   : > { %s3370_s0 = scalar_lea.hbm %s3990_s7, 128  ;;  %s3374_s25 = scalar_lea.hbm %s4038_s4, 256 }
 0x7bc   : > { %p3371_p2 = scmp.ne.s32.totalorder %s3990_s7, %s3370_s0  ;;  %p3375_p8 = scmp.lt.u32.totalorder %s3990_s7, %s4038_s4 }
 0x7bd   : > { %p3376_p13 = scmp.lt.u32.totalorder %s3374_s25, %s3370_s0  ;;  %p3378_p10 = scmp.lt.u32.totalorder %s3370_s0, %s3990_s7 }
 0x7be   : > { %p3372_p7 = pnand %p3371_p2, %p4058_p1 }
 0x7bf   : > { %p3377_p3 = por %p3376_p13, %p3375_p8 }
 0x7c0   : > { %p3373_p12 = pneg %p3372_p7 }
 0x7c1   : > { %p3379_p5 = por %p3378_p10, %p3377_p3 }
 0x7c3   : > { %p3380_p4 = pnand %p3379_p5, %p3373_p12 }
 0x7c5   : > { %3383 = shalt.err (!%p3380_p4)
}
 0x7c6   : > { %3204 = dma.vmem_to_hbm [thread:$0]  (%p4058_p1), %s3992_s9, 128, %s3990_s7, %s2419_s6  }
 0x7c7 PF: > { %s2444_s10 = sand.u32 1, %s3418_s15   ;;  %p4059_p6 = scmp.ne.s32.totalorder %s4046_s28, 0 }
 0x7c8   : > { %p4060_p9 = scmp.ge.s32.totalorder %s3430_s18, 2  ;;  %s2445_s12 = scalar_lea.sflag [#allocation4], %s2444_s10 }
 0x7ca   : > { %p3218_p11 = pnand %p4060_p9, %p4059_p6 }
 0x7cc   : > { %3413 = dma.done.wait (!%p3218_p11), %s2445_s12, 128  }
 0x7cd   : > { %3415 = vsyncadd (!%p3218_p11), %s2445_s12, 4294967168  ;;  %p19_p0 = scmp.ge.s32.totalorder %s3502_s21, 4   ;;  %s4061_s15 = smov %s3422_s16 }
 0x7ce   : > { %s4062_s16 = smov %s3426_s17  ;;  %s4063_s17 = smov %s3514_s24 }
 0x7cf   : > { %s4064_s18 = smov %s3502_s21  ;;  %21 = sbr.rel (!%p19_p0) target bundleno = 9 (0x9), region = 93 }
 0x7d6   :  { %2450 = vsyncpa [#allocation3], 1 }
 0x7d7   :  { %2452 = vsyncpa [#allocation3 + $0x1], 1 }
 0x7d8   :  { %2453 = vsyncpa [#allocation8], 1 }
 0x7d9   :  { %2454 = vsyncpa [#allocation4], 1 }
 0x7da   :  { %2456 = vsyncpa [#allocation4 + $0x1], 1 }
 0x7db   :  { %2457 = vsyncpa [#allocation5], 1 }
 0x7dc   :  { %2459 = vsyncpa [#allocation5 + $0x1], 1 }

</bundles_post_ra>
